<compile_context>
chip_gen: v7x
topology: tpu7x:2x2x1
jax: 0.10.0
libtpu: 0.0.40
codegen_flags: <defaults>
</compile_context>

<pallas_src>
import functools

import jax
import jax.numpy as jnp
import numpy as np
from jax.experimental import pallas as pl
from jax.experimental.pallas import tpu as pltpu


# ----------------------------------------------------------------------------
# Host-side TreeMatrix (adjacency: data[i, j] = 1 iff j is a parent of i).
# Indices are assumed to already be in topological order (roots first), so
# iteration order == range(L) and reversed iteration == leaves-first.
# ----------------------------------------------------------------------------
class TreeMatrix:
    def __init__(self, data):
        self.data = np.asarray(data, dtype=np.int32)
        n = self.data.shape[0]
        self._parents = tuple(
            tuple(int(j) for j in np.nonzero(self.data[i, :])[0]) for i in range(n)
        )
        self._children = tuple(
            tuple(int(i) for i in np.nonzero(self.data[:, j])[0]) for j in range(n)
        )

    def __len__(self):
        return self.data.shape[0]

    def parents(self, i):
        return self._parents[i]

    def children(self, j):
        return self._children[j]


def _round_up(x, m):
    return -(-x // m) * m


# ----------------------------------------------------------------------------
# Pallas kernel
# ----------------------------------------------------------------------------
def _treecrf_kernel(x_ref, pairs_ref, o_ref, alphas_ref, betas_ref, *,
                    up_edges, down_edges):
    # Layout: x/o/alphas/betas are (L, C, TB) in VMEM — labels leading,
    # classes on sublanes, (padded) batch on lanes.
    # pairs_ref is (E, C, C, 1): one (C_i, C_j) block per edge in schedule
    # order; trailing 1 keeps the lane-broadcast free of relayouts.
    alphas_ref[...] = jnp.zeros_like(alphas_ref)
    betas_ref[...] = jnp.zeros_like(betas_ref)

    def send_message(msg_ref, sender_j, receiver_i, edge_idx):
        # local[y_j, b] = X[j, y_j, b] + carried_msg[j, y_j, b]
        local = x_ref[sender_j] + msg_ref[sender_j]            # (C, TB)
        pair_ij = pairs_ref[edge_idx]                          # (C_i, C_j, 1)
        # t[y_i, y_j, b] = local[y_j, b] + pairs[i, j, y_i, y_j]
        t = local[None, :, :] + pair_ij                        # (C_i, C_j, TB)
        m = jnp.max(t, axis=1, keepdims=True)                  # (C_i, 1, TB)
        lse = m[:, 0, :] + jnp.log(jnp.sum(jnp.exp(t - m), axis=1))  # (C_i, TB)
        msg_ref[receiver_i] = msg_ref[receiver_i] + lse        # one store / edge

    # Upward pass: leaves -> roots (reverse topological order).
    for e, (i, j) in enumerate(up_edges):
        send_message(alphas_ref, j, i, e)

    # Downward pass: roots -> leaves (topological order).
    # (Faithful to torch-treecrf: downward carry is X[j] + betas[j] only.)
    for e, (i, j) in enumerate(down_edges):
        send_message(betas_ref, j, i, len(up_edges) + e)

    # Marginals: logP = scores - logsumexp_over_classes(scores), all labels
    # at once (single batched reduction over the class/sublane axis).
    scores = x_ref[...] + alphas_ref[...] + betas_ref[...]     # (L, C, TB)
    m = jnp.max(scores, axis=1, keepdims=True)                 # (L, 1, TB)
    logz = m + jnp.log(jnp.sum(jnp.exp(scores - m), axis=1, keepdims=True))
    o_ref[...] = scores - logz


def tree_crf_layer_forward(x_blc, pairs, parents, children):
    """x_blc: (B, L, C) emissions; pairs: (L, L, C, C). Returns logP (B, L, C)."""
    B, L, C = x_blc.shape

    # Static edge schedule (trace-time unrolled in the kernel).
    up_edges = tuple((i, j) for j in reversed(range(L)) for i in parents[j])
    down_edges = tuple((i, j) for j in range(L) for i in children[j])
    edges = list(up_edges) + list(down_edges)

    # ------------------------------------------------------------------
    # Batch tile: lane-dense (multiple of 128), grown while it fits a
    # conservative VMEM budget (sized for v7x's 64 MiB / default scoped 32 MiB).
    # ------------------------------------------------------------------
    c_sub = _round_up(C, 8)                       # sublane-padded class dim
    TB = 128
    while (TB < 1024 and TB * 2 <= _round_up(B, 128)
           and 6 * L * c_sub * (TB * 2) * 4 < (20 << 20)):
        TB *= 2
    B_pad = _round_up(B, TB)

    # Gather per-edge pair blocks host-side -> (E, C, C, 1) VMEM table.
    pairs = jnp.asarray(pairs, jnp.float32)
    if edges:
        i_idx = np.array([e[0] for e in edges], dtype=np.int32)
        j_idx = np.array([e[1] for e in edges], dtype=np.int32)
        pairs_e = pairs[i_idx, j_idx]                          # (E, C, C)
    else:
        pairs_e = jnp.zeros((1, C, C), jnp.float32)            # dummy, never read
    pairs_e = pairs_e.reshape(pairs_e.shape[0], C, C, 1)
    E = pairs_e.shape[0]

    # Input layout: (L, C, B_pad) — classes on sublanes, batch on lanes.
    # (With C=2 this is the lane-dense choice; for large C use (B, L, C).)
    x_lcb = jnp.transpose(x_blc, (1, 2, 0)).astype(jnp.float32)
    if B_pad != B:
        x_lcb = jnp.pad(x_lcb, ((0, 0), (0, 0), (0, B_pad - B)))

    # VMEM budget: in(2) + out(2) + alphas + betas tiles, plus the pair table
    # (double-buffered), with 2x headroom, capped below v7x physical VMEM.
    tile_pad = L * c_sub * TB * 4
    pairs_pad = E * C * c_sub * 128 * 4
    vmem_limit = int(min(max(2 * (6 * tile_pad + 2 * pairs_pad), 8 << 20),
                         40 << 20))

    kernel = functools.partial(_treecrf_kernel,
                               up_edges=up_edges, down_edges=down_edges)

    out_lcb = pl.pallas_call(
        kernel,
        out_shape=jax.ShapeDtypeStruct((L, C, B_pad), jnp.float32),
        grid_spec=pltpu.PrefetchScalarGridSpec(
            num_scalar_prefetch=0,
            grid=(B_pad // TB,),
            in_specs=[
                pl.BlockSpec((L, C, TB), lambda b: (0, 0, b)),        # emissions
                pl.BlockSpec((E, C, C, 1), lambda b: (0, 0, 0, 0)),   # pair table
            ],
            out_specs=pl.BlockSpec((L, C, TB), lambda b: (0, 0, b)),
            scratch_shapes=[
                pltpu.VMEM((L, C, TB), jnp.float32),   # alphas
                pltpu.VMEM((L, C, TB), jnp.float32),   # betas
            ],
        ),
        compiler_params=pltpu.CompilerParams(
            dimension_semantics=("parallel",),     # megacore on v7x; no-op v5e/v6e
            vmem_limit_bytes=vmem_limit,
        ),
    )(x_lcb, pairs_e)

    # Strip batch padding, back to (B, L, C).
    return jnp.transpose(out_lcb[:, :, :B], (2, 0, 1))


# ----------------------------------------------------------------------------
# Pure-numpy reference (mirrors the PyTorch module semantics)
# ----------------------------------------------------------------------------
def reference_forward(X, pairs, tree):
    B, L, C = X.shape
    alphas = np.zeros((B, L, C), dtype=X.dtype)
    for j in reversed(range(L)):
        local = X[:, j, :] + alphas[:, j, :]
        for i in tree.parents(j):
            t = local[:, None, :] + pairs[i, j][None, :, :]       # (B, Ci, Cj)
            m = t.max(axis=2, keepdims=True)
            alphas[:, i, :] += m[..., 0] + np.log(np.exp(t - m).sum(axis=2))
    betas = np.zeros((B, L, C), dtype=X.dtype)
    for j in range(L):
        local = X[:, j, :] + betas[:, j, :]
        for i in tree.children(j):
            t = local[:, None, :] + pairs[i, j][None, :, :]
            m = t.max(axis=2, keepdims=True)
            betas[:, i, :] += m[..., 0] + np.log(np.exp(t - m).sum(axis=2))
    scores = X + alphas + betas
    m = scores.max(axis=-1, keepdims=True)
    logZ = m + np.log(np.exp(scores - m).sum(axis=-1, keepdims=True))
    return scores - logZ


# TODO(synk): `_free_energy` and `load_state_dict` are not part of forward()
# (and reference undefined names in the original source); only forward() is
# implemented here.

if __name__ == "__main__":
    B, L, C = 8, 8, 2   # batch, n_labels, n_classes

    # Small binary-ish tree, roots-first indexing (topological order).
    adjacency = np.zeros((L, L), dtype=np.int32)
    for child, parent in {1: 0, 2: 0, 3: 1, 4: 1, 5: 2, 6: 2, 7: 3}.items():
        adjacency[child, parent] = 1
    tree = TreeMatrix(adjacency)
    parents = tuple(tree.parents(i) for i in range(L))
    children = tuple(tree.children(i) for i in range(L))

    # Deterministic inputs / parameters (pairs ~ U(0.1, 1.0) as in __init__).
    key = jax.random.PRNGKey(0)
    kx, kp = jax.random.split(key)
    X = jax.random.normal(kx, (B, L, C), dtype=jnp.float32)
    pairs = jax.random.uniform(kp, (L, L, C, C), dtype=jnp.float32,
                               minval=0.1, maxval=1.0)

    logP = tree_crf_layer_forward(X, pairs, parents, children)
    logP = jax.block_until_ready(logP)

    ref = reference_forward(np.asarray(X, np.float64),
                            np.asarray(pairs, np.float64), tree)

    assert logP.shape == (B, L, C)
    assert np.all(np.asarray(logP) <= 1e-4)       # log-probabilities
    np.testing.assert_allclose(np.asarray(logP), ref, rtol=1e-4, atol=1e-4)

    print("KERNEL_OK")
</pallas_src>

<mosaic_0001>
module attributes {stable_mosaic.version = 11 : i64} {
  func.func @_treecrf_kernel(%arg0: i32, %arg1: memref<8x2x128xf32, #tpu.memory_space<vmem>>, %arg2: memref<14x2x2x1xf32, #tpu.memory_space<vmem>>, %arg3: memref<8x2x128xf32, #tpu.memory_space<vmem>>, %arg4: memref<8x2x128xf32, #tpu.memory_space<vmem>>, %arg5: memref<8x2x128xf32, #tpu.memory_space<vmem>>) attributes {dimension_semantics = [#tpu.dimension_semantics<parallel>], iteration_bounds = array<i64: 1>, scalar_prefetch = 0 : i64, scratch_operands = 2 : i64, tpu.core_type = #tpu.core_type<tc>, window_params = [{transform_indices = @transform_0, window_bounds = array<i64: 8, 2, 128>}, {pipeline_mode = #tpu.pipeline_mode<synchronous>, transform_indices = @transform_1, window_bounds = array<i64: 14, 2, 2, 1>}, {transform_indices = @transform_2, window_bounds = array<i64: 8, 2, 128>}]} {
    %cst = arith.constant 0.000000e+00 : f32
    %0 = vector.broadcast %cst : f32 to vector<8x2x128xf32>
    %c0 = arith.constant 0 : index
    %c0_0 = arith.constant 0 : index
    %c0_1 = arith.constant 0 : index
    %1 = vector.load %arg4[%c0, %c0_0, %c0_1] : memref<8x2x128xf32, #tpu.memory_space<vmem>>, vector<8x2x128xf32>
    tpu.vector_store %arg4[%c0, %c0_0, %c0_1], %0 {strides = array<i32>} : memref<8x2x128xf32, #tpu.memory_space<vmem>>, vector<8x2x128xf32>,
    %cst_2 = arith.constant 0.000000e+00 : f32
    %2 = vector.broadcast %cst_2 : f32 to vector<8x2x128xf32>
    %c0_3 = arith.constant 0 : index
    %c0_4 = arith.constant 0 : index
    %c0_5 = arith.constant 0 : index
    %3 = vector.load %arg5[%c0_3, %c0_4, %c0_5] : memref<8x2x128xf32, #tpu.memory_space<vmem>>, vector<8x2x128xf32>
    tpu.vector_store %arg5[%c0_3, %c0_4, %c0_5], %2 {strides = array<i32>} : memref<8x2x128xf32, #tpu.memory_space<vmem>>, vector<8x2x128xf32>,
    %c7 = arith.constant 7 : index
    %c0_6 = arith.constant 0 : index
    %c0_7 = arith.constant 0 : index
    %4 = vector.load %arg1[%c7, %c0_6, %c0_7] : memref<8x2x128xf32, #tpu.memory_space<vmem>>, vector<1x2x128xf32>
    %5 = vector.shape_cast %4 : vector<1x2x128xf32> to vector<2x128xf32>
    %c7_8 = arith.constant 7 : index
    %c0_9 = arith.constant 0 : index
    %c0_10 = arith.constant 0 : index
    %6 = vector.load %arg4[%c7_8, %c0_9, %c0_10] : memref<8x2x128xf32, #tpu.memory_space<vmem>>, vector<1x2x128xf32>
    %7 = vector.shape_cast %6 : vector<1x2x128xf32> to vector<2x128xf32>
    %8 = arith.addf %5, %7 : vector<2x128xf32>
    %c0_11 = arith.constant 0 : index
    %c0_12 = arith.constant 0 : index
    %c0_13 = arith.constant 0 : index
    %c0_14 = arith.constant 0 : index
    %9 = vector.load %arg2[%c0_11, %c0_12, %c0_13, %c0_14] : memref<14x2x2x1xf32, #tpu.memory_space<vmem>>, vector<1x2x2x1xf32>
    %10 = vector.shape_cast %9 : vector<1x2x2x1xf32> to vector<2x2x1xf32>
    %11 = vector.shape_cast %8 : vector<2x128xf32> to vector<1x2x128xf32>
    %12 = vector.broadcast %11 : vector<1x2x128xf32> to vector<2x2x128xf32>
    %13 = vector.broadcast %10 : vector<2x2x1xf32> to vector<2x2x128xf32>
    %14 = arith.addf %12, %13 : vector<2x2x128xf32>
    %cst_15 = arith.constant dense<0xFF800000> : vector<2x128xf32>
    %15 = vector.multi_reduction <maximumf>, %14, %cst_15 [1] : vector<2x2x128xf32> to vector<2x128xf32>
    %16 = vector.shape_cast %15 : vector<2x128xf32> to vector<2x1x128xf32>
    %17 = vector.shape_cast %16 : vector<2x1x128xf32> to vector<2x128xf32>
    %18 = vector.broadcast %16 : vector<2x1x128xf32> to vector<2x2x128xf32>
    %19 = arith.subf %14, %18 : vector<2x2x128xf32>
    %20 = math.exp %19 : vector<2x2x128xf32>
    %cst_16 = arith.constant dense<0.000000e+00> : vector<2x128xf32>
    %21 = vector.multi_reduction <add>, %20, %cst_16 [1] : vector<2x2x128xf32> to vector<2x128xf32>
    %22 = math.log %21 : vector<2x128xf32>
    %23 = arith.addf %17, %22 : vector<2x128xf32>
    %c3 = arith.constant 3 : index
    %c0_17 = arith.constant 0 : index
    %c0_18 = arith.constant 0 : index
    %24 = vector.load %arg4[%c3, %c0_17, %c0_18] : memref<8x2x128xf32, #tpu.memory_space<vmem>>, vector<1x2x128xf32>
    %25 = vector.shape_cast %24 : vector<1x2x128xf32> to vector<2x128xf32>
    %26 = arith.addf %25, %23 : vector<2x128xf32>
    %c3_19 = arith.constant 3 : index
    %c0_20 = arith.constant 0 : index
    %c0_21 = arith.constant 0 : index
    %27 = vector.load %arg4[%c3_19, %c0_20, %c0_21] : memref<8x2x128xf32, #tpu.memory_space<vmem>>, vector<1x2x128xf32>
    %28 = vector.shape_cast %27 : vector<1x2x128xf32> to vector<2x128xf32>
    %29 = vector.shape_cast %26 : vector<2x128xf32> to vector<1x2x128xf32>
    tpu.vector_store %arg4[%c3_19, %c0_20, %c0_21], %29 {strides = array<i32>} : memref<8x2x128xf32, #tpu.memory_space<vmem>>, vector<1x2x128xf32>,
    %c6 = arith.constant 6 : index
    %c0_22 = arith.constant 0 : index
    %c0_23 = arith.constant 0 : index
    %30 = vector.load %arg1[%c6, %c0_22, %c0_23] : memref<8x2x128xf32, #tpu.memory_space<vmem>>, vector<1x2x128xf32>
    %31 = vector.shape_cast %30 : vector<1x2x128xf32> to vector<2x128xf32>
    %c6_24 = arith.constant 6 : index
    %c0_25 = arith.constant 0 : index
    %c0_26 = arith.constant 0 : index
    %32 = vector.load %arg4[%c6_24, %c0_25, %c0_26] : memref<8x2x128xf32, #tpu.memory_space<vmem>>, vector<1x2x128xf32>
    %33 = vector.shape_cast %32 : vector<1x2x128xf32> to vector<2x128xf32>
    %34 = arith.addf %31, %33 : vector<2x128xf32>
    %c1 = arith.constant 1 : index
    %c0_27 = arith.constant 0 : index
    %c0_28 = arith.constant 0 : index
    %c0_29 = arith.constant 0 : index
    %35 = vector.load %arg2[%c1, %c0_27, %c0_28, %c0_29] : memref<14x2x2x1xf32, #tpu.memory_space<vmem>>, vector<1x2x2x1xf32>
    %36 = vector.shape_cast %35 : vector<1x2x2x1xf32> to vector<2x2x1xf32>
    %37 = vector.shape_cast %34 : vector<2x128xf32> to vector<1x2x128xf32>
    %38 = vector.broadcast %37 : vector<1x2x128xf32> to vector<2x2x128xf32>
    %39 = vector.broadcast %36 : vector<2x2x1xf32> to vector<2x2x128xf32>
    %40 = arith.addf %38, %39 : vector<2x2x128xf32>
    %cst_30 = arith.constant dense<0xFF800000> : vector<2x128xf32>
    %41 = vector.multi_reduction <maximumf>, %40, %cst_30 [1] : vector<2x2x128xf32> to vector<2x128xf32>
    %42 = vector.shape_cast %41 : vector<2x128xf32> to vector<2x1x128xf32>
    %43 = vector.shape_cast %42 : vector<2x1x128xf32> to vector<2x128xf32>
    %44 = vector.broadcast %42 : vector<2x1x128xf32> to vector<2x2x128xf32>
    %45 = arith.subf %40, %44 : vector<2x2x128xf32>
    %46 = math.exp %45 : vector<2x2x128xf32>
    %cst_31 = arith.constant dense<0.000000e+00> : vector<2x128xf32>
    %47 = vector.multi_reduction <add>, %46, %cst_31 [1] : vector<2x2x128xf32> to vector<2x128xf32>
    %48 = math.log %47 : vector<2x128xf32>
    %49 = arith.addf %43, %48 : vector<2x128xf32>
    %c2 = arith.constant 2 : index
    %c0_32 = arith.constant 0 : index
    %c0_33 = arith.constant 0 : index
    %50 = vector.load %arg4[%c2, %c0_32, %c0_33] : memref<8x2x128xf32, #tpu.memory_space<vmem>>, vector<1x2x128xf32>
    %51 = vector.shape_cast %50 : vector<1x2x128xf32> to vector<2x128xf32>
    %52 = arith.addf %51, %49 : vector<2x128xf32>
    %c2_34 = arith.constant 2 : index
    %c0_35 = arith.constant 0 : index
    %c0_36 = arith.constant 0 : index
    %53 = vector.load %arg4[%c2_34, %c0_35, %c0_36] : memref<8x2x128xf32, #tpu.memory_space<vmem>>, vector<1x2x128xf32>
    %54 = vector.shape_cast %53 : vector<1x2x128xf32> to vector<2x128xf32>
    %55 = vector.shape_cast %52 : vector<2x128xf32> to vector<1x2x128xf32>
    tpu.vector_store %arg4[%c2_34, %c0_35, %c0_36], %55 {strides = array<i32>} : memref<8x2x128xf32, #tpu.memory_space<vmem>>, vector<1x2x128xf32>,
    %c5 = arith.constant 5 : index
    %c0_37 = arith.constant 0 : index
    %c0_38 = arith.constant 0 : index
    %56 = vector.load %arg1[%c5, %c0_37, %c0_38] : memref<8x2x128xf32, #tpu.memory_space<vmem>>, vector<1x2x128xf32>
    %57 = vector.shape_cast %56 : vector<1x2x128xf32> to vector<2x128xf32>
    %c5_39 = arith.constant 5 : index
    %c0_40 = arith.constant 0 : index
    %c0_41 = arith.constant 0 : index
    %58 = vector.load %arg4[%c5_39, %c0_40, %c0_41] : memref<8x2x128xf32, #tpu.memory_space<vmem>>, vector<1x2x128xf32>
    %59 = vector.shape_cast %58 : vector<1x2x128xf32> to vector<2x128xf32>
    %60 = arith.addf %57, %59 : vector<2x128xf32>
    %c2_42 = arith.constant 2 : index
    %c0_43 = arith.constant 0 : index
    %c0_44 = arith.constant 0 : index
    %c0_45 = arith.constant 0 : index
    %61 = vector.load %arg2[%c2_42, %c0_43, %c0_44, %c0_45] : memref<14x2x2x1xf32, #tpu.memory_space<vmem>>, vector<1x2x2x1xf32>
    %62 = vector.shape_cast %61 : vector<1x2x2x1xf32> to vector<2x2x1xf32>
    %63 = vector.shape_cast %60 : vector<2x128xf32> to vector<1x2x128xf32>
    %64 = vector.broadcast %63 : vector<1x2x128xf32> to vector<2x2x128xf32>
    %65 = vector.broadcast %62 : vector<2x2x1xf32> to vector<2x2x128xf32>
    %66 = arith.addf %64, %65 : vector<2x2x128xf32>
    %cst_46 = arith.constant dense<0xFF800000> : vector<2x128xf32>
    %67 = vector.multi_reduction <maximumf>, %66, %cst_46 [1] : vector<2x2x128xf32> to vector<2x128xf32>
    %68 = vector.shape_cast %67 : vector<2x128xf32> to vector<2x1x128xf32>
    %69 = vector.shape_cast %68 : vector<2x1x128xf32> to vector<2x128xf32>
    %70 = vector.broadcast %68 : vector<2x1x128xf32> to vector<2x2x128xf32>
    %71 = arith.subf %66, %70 : vector<2x2x128xf32>
    %72 = math.exp %71 : vector<2x2x128xf32>
    %cst_47 = arith.constant dense<0.000000e+00> : vector<2x128xf32>
    %73 = vector.multi_reduction <add>, %72, %cst_47 [1] : vector<2x2x128xf32> to vector<2x128xf32>
    %74 = math.log %73 : vector<2x128xf32>
    %75 = arith.addf %69, %74 : vector<2x128xf32>
    %c2_48 = arith.constant 2 : index
    %c0_49 = arith.constant 0 : index
    %c0_50 = arith.constant 0 : index
    %76 = vector.load %arg4[%c2_48, %c0_49, %c0_50] : memref<8x2x128xf32, #tpu.memory_space<vmem>>, vector<1x2x128xf32>
    %77 = vector.shape_cast %76 : vector<1x2x128xf32> to vector<2x128xf32>
    %78 = arith.addf %77, %75 : vector<2x128xf32>
    %c2_51 = arith.constant 2 : index
    %c0_52 = arith.constant 0 : index
    %c0_53 = arith.constant 0 : index
    %79 = vector.load %arg4[%c2_51, %c0_52, %c0_53] : memref<8x2x128xf32, #tpu.memory_space<vmem>>, vector<1x2x128xf32>
    %80 = vector.shape_cast %79 : vector<1x2x128xf32> to vector<2x128xf32>
    %81 = vector.shape_cast %78 : vector<2x128xf32> to vector<1x2x128xf32>
    tpu.vector_store %arg4[%c2_51, %c0_52, %c0_53], %81 {strides = array<i32>} : memref<8x2x128xf32, #tpu.memory_space<vmem>>, vector<1x2x128xf32>,
    %c4 = arith.constant 4 : index
    %c0_54 = arith.constant 0 : index
    %c0_55 = arith.constant 0 : index
    %82 = vector.load %arg1[%c4, %c0_54, %c0_55] : memref<8x2x128xf32, #tpu.memory_space<vmem>>, vector<1x2x128xf32>
    %83 = vector.shape_cast %82 : vector<1x2x128xf32> to vector<2x128xf32>
    %c4_56 = arith.constant 4 : index
    %c0_57 = arith.constant 0 : index
    %c0_58 = arith.constant 0 : index
    %84 = vector.load %arg4[%c4_56, %c0_57, %c0_58] : memref<8x2x128xf32, #tpu.memory_space<vmem>>, vector<1x2x128xf32>
    %85 = vector.shape_cast %84 : vector<1x2x128xf32> to vector<2x128xf32>
    %86 = arith.addf %83, %85 : vector<2x128xf32>
    %c3_59 = arith.constant 3 : index
    %c0_60 = arith.constant 0 : index
    %c0_61 = arith.constant 0 : index
    %c0_62 = arith.constant 0 : index
    %87 = vector.load %arg2[%c3_59, %c0_60, %c0_61, %c0_62] : memref<14x2x2x1xf32, #tpu.memory_space<vmem>>, vector<1x2x2x1xf32>
    %88 = vector.shape_cast %87 : vector<1x2x2x1xf32> to vector<2x2x1xf32>
    %89 = vector.shape_cast %86 : vector<2x128xf32> to vector<1x2x128xf32>
    %90 = vector.broadcast %89 : vector<1x2x128xf32> to vector<2x2x128xf32>
    %91 = vector.broadcast %88 : vector<2x2x1xf32> to vector<2x2x128xf32>
    %92 = arith.addf %90, %91 : vector<2x2x128xf32>
    %cst_63 = arith.constant dense<0xFF800000> : vector<2x128xf32>
    %93 = vector.multi_reduction <maximumf>, %92, %cst_63 [1] : vector<2x2x128xf32> to vector<2x128xf32>
    %94 = vector.shape_cast %93 : vector<2x128xf32> to vector<2x1x128xf32>
    %95 = vector.shape_cast %94 : vector<2x1x128xf32> to vector<2x128xf32>
    %96 = vector.broadcast %94 : vector<2x1x128xf32> to vector<2x2x128xf32>
    %97 = arith.subf %92, %96 : vector<2x2x128xf32>
    %98 = math.exp %97 : vector<2x2x128xf32>
    %cst_64 = arith.constant dense<0.000000e+00> : vector<2x128xf32>
    %99 = vector.multi_reduction <add>, %98, %cst_64 [1] : vector<2x2x128xf32> to vector<2x128xf32>
    %100 = math.log %99 : vector<2x128xf32>
    %101 = arith.addf %95, %100 : vector<2x128xf32>
    %c1_65 = arith.constant 1 : index
    %c0_66 = arith.constant 0 : index
    %c0_67 = arith.constant 0 : index
    %102 = vector.load %arg4[%c1_65, %c0_66, %c0_67] : memref<8x2x128xf32, #tpu.memory_space<vmem>>, vector<1x2x128xf32>
    %103 = vector.shape_cast %102 : vector<1x2x128xf32> to vector<2x128xf32>
    %104 = arith.addf %103, %101 : vector<2x128xf32>
    %c1_68 = arith.constant 1 : index
    %c0_69 = arith.constant 0 : index
    %c0_70 = arith.constant 0 : index
    %105 = vector.load %arg4[%c1_68, %c0_69, %c0_70] : memref<8x2x128xf32, #tpu.memory_space<vmem>>, vector<1x2x128xf32>
    %106 = vector.shape_cast %105 : vector<1x2x128xf32> to vector<2x128xf32>
    %107 = vector.shape_cast %104 : vector<2x128xf32> to vector<1x2x128xf32>
    tpu.vector_store %arg4[%c1_68, %c0_69, %c0_70], %107 {strides = array<i32>} : memref<8x2x128xf32, #tpu.memory_space<vmem>>, vector<1x2x128xf32>,
    %c3_71 = arith.constant 3 : index
    %c0_72 = arith.constant 0 : index
    %c0_73 = arith.constant 0 : index
    %108 = vector.load %arg1[%c3_71, %c0_72, %c0_73] : memref<8x2x128xf32, #tpu.memory_space<vmem>>, vector<1x2x128xf32>
    %109 = vector.shape_cast %108 : vector<1x2x128xf32> to vector<2x128xf32>
    %c3_74 = arith.constant 3 : index
    %c0_75 = arith.constant 0 : index
    %c0_76 = arith.constant 0 : index
    %110 = vector.load %arg4[%c3_74, %c0_75, %c0_76] : memref<8x2x128xf32, #tpu.memory_space<vmem>>, vector<1x2x128xf32>
    %111 = vector.shape_cast %110 : vector<1x2x128xf32> to vector<2x128xf32>
    %112 = arith.addf %109, %111 : vector<2x128xf32>
    %c4_77 = arith.constant 4 : index
    %c0_78 = arith.constant 0 : index
    %c0_79 = arith.constant 0 : index
    %c0_80 = arith.constant 0 : index
    %113 = vector.load %arg2[%c4_77, %c0_78, %c0_79, %c0_80] : memref<14x2x2x1xf32, #tpu.memory_space<vmem>>, vector<1x2x2x1xf32>
    %114 = vector.shape_cast %113 : vector<1x2x2x1xf32> to vector<2x2x1xf32>
    %115 = vector.shape_cast %112 : vector<2x128xf32> to vector<1x2x128xf32>
    %116 = vector.broadcast %115 : vector<1x2x128xf32> to vector<2x2x128xf32>
    %117 = vector.broadcast %114 : vector<2x2x1xf32> to vector<2x2x128xf32>
    %118 = arith.addf %116, %117 : vector<2x2x128xf32>
    %cst_81 = arith.constant dense<0xFF800000> : vector<2x128xf32>
    %119 = vector.multi_reduction <maximumf>, %118, %cst_81 [1] : vector<2x2x128xf32> to vector<2x128xf32>
    %120 = vector.shape_cast %119 : vector<2x128xf32> to vector<2x1x128xf32>
    %121 = vector.shape_cast %120 : vector<2x1x128xf32> to vector<2x128xf32>
    %122 = vector.broadcast %120 : vector<2x1x128xf32> to vector<2x2x128xf32>
    %123 = arith.subf %118, %122 : vector<2x2x128xf32>
    %124 = math.exp %123 : vector<2x2x128xf32>
    %cst_82 = arith.constant dense<0.000000e+00> : vector<2x128xf32>
    %125 = vector.multi_reduction <add>, %124, %cst_82 [1] : vector<2x2x128xf32> to vector<2x128xf32>
    %126 = math.log %125 : vector<2x128xf32>
    %127 = arith.addf %121, %126 : vector<2x128xf32>
    %c1_83 = arith.constant 1 : index
    %c0_84 = arith.constant 0 : index
    %c0_85 = arith.constant 0 : index
    %128 = vector.load %arg4[%c1_83, %c0_84, %c0_85] : memref<8x2x128xf32, #tpu.memory_space<vmem>>, vector<1x2x128xf32>
    %129 = vector.shape_cast %128 : vector<1x2x128xf32> to vector<2x128xf32>
    %130 = arith.addf %129, %127 : vector<2x128xf32>
    %c1_86 = arith.constant 1 : index
    %c0_87 = arith.constant 0 : index
    %c0_88 = arith.constant 0 : index
    %131 = vector.load %arg4[%c1_86, %c0_87, %c0_88] : memref<8x2x128xf32, #tpu.memory_space<vmem>>, vector<1x2x128xf32>
    %132 = vector.shape_cast %131 : vector<1x2x128xf32> to vector<2x128xf32>
    %133 = vector.shape_cast %130 : vector<2x128xf32> to vector<1x2x128xf32>
    tpu.vector_store %arg4[%c1_86, %c0_87, %c0_88], %133 {strides = array<i32>} : memref<8x2x128xf32, #tpu.memory_space<vmem>>, vector<1x2x128xf32>,
    %c2_89 = arith.constant 2 : index
    %c0_90 = arith.constant 0 : index
    %c0_91 = arith.constant 0 : index
    %134 = vector.load %arg1[%c2_89, %c0_90, %c0_91] : memref<8x2x128xf32, #tpu.memory_space<vmem>>, vector<1x2x128xf32>
    %135 = vector.shape_cast %134 : vector<1x2x128xf32> to vector<2x128xf32>
    %c2_92 = arith.constant 2 : index
    %c0_93 = arith.constant 0 : index
    %c0_94 = arith.constant 0 : index
    %136 = vector.load %arg4[%c2_92, %c0_93, %c0_94] : memref<8x2x128xf32, #tpu.memory_space<vmem>>, vector<1x2x128xf32>
    %137 = vector.shape_cast %136 : vector<1x2x128xf32> to vector<2x128xf32>
    %138 = arith.addf %135, %137 : vector<2x128xf32>
    %c5_95 = arith.constant 5 : index
    %c0_96 = arith.constant 0 : index
    %c0_97 = arith.constant 0 : index
    %c0_98 = arith.constant 0 : index
    %139 = vector.load %arg2[%c5_95, %c0_96, %c0_97, %c0_98] : memref<14x2x2x1xf32, #tpu.memory_space<vmem>>, vector<1x2x2x1xf32>
    %140 = vector.shape_cast %139 : vector<1x2x2x1xf32> to vector<2x2x1xf32>
    %141 = vector.shape_cast %138 : vector<2x128xf32> to vector<1x2x128xf32>
    %142 = vector.broadcast %141 : vector<1x2x128xf32> to vector<2x2x128xf32>
    %143 = vector.broadcast %140 : vector<2x2x1xf32> to vector<2x2x128xf32>
    %144 = arith.addf %142, %143 : vector<2x2x128xf32>
    %cst_99 = arith.constant dense<0xFF800000> : vector<2x128xf32>
    %145 = vector.multi_reduction <maximumf>, %144, %cst_99 [1] : vector<2x2x128xf32> to vector<2x128xf32>
    %146 = vector.shape_cast %145 : vector<2x128xf32> to vector<2x1x128xf32>
    %147 = vector.shape_cast %146 : vector<2x1x128xf32> to vector<2x128xf32>
    %148 = vector.broadcast %146 : vector<2x1x128xf32> to vector<2x2x128xf32>
    %149 = arith.subf %144, %148 : vector<2x2x128xf32>
    %150 = math.exp %149 : vector<2x2x128xf32>
    %cst_100 = arith.constant dense<0.000000e+00> : vector<2x128xf32>
    %151 = vector.multi_reduction <add>, %150, %cst_100 [1] : vector<2x2x128xf32> to vector<2x128xf32>
    %152 = math.log %151 : vector<2x128xf32>
    %153 = arith.addf %147, %152 : vector<2x128xf32>
    %c0_101 = arith.constant 0 : index
    %c0_102 = arith.constant 0 : index
    %c0_103 = arith.constant 0 : index
    %154 = vector.load %arg4[%c0_101, %c0_102, %c0_103] : memref<8x2x128xf32, #tpu.memory_space<vmem>>, vector<1x2x128xf32>
    %155 = vector.shape_cast %154 : vector<1x2x128xf32> to vector<2x128xf32>
    %156 = arith.addf %155, %153 : vector<2x128xf32>
    %c0_104 = arith.constant 0 : index
    %c0_105 = arith.constant 0 : index
    %c0_106 = arith.constant 0 : index
    %157 = vector.load %arg4[%c0_104, %c0_105, %c0_106] : memref<8x2x128xf32, #tpu.memory_space<vmem>>, vector<1x2x128xf32>
    %158 = vector.shape_cast %157 : vector<1x2x128xf32> to vector<2x128xf32>
    %159 = vector.shape_cast %156 : vector<2x128xf32> to vector<1x2x128xf32>
    tpu.vector_store %arg4[%c0_104, %c0_105, %c0_106], %159 {strides = array<i32>} : memref<8x2x128xf32, #tpu.memory_space<vmem>>, vector<1x2x128xf32>,
    %c1_107 = arith.constant 1 : index
    %c0_108 = arith.constant 0 : index
    %c0_109 = arith.constant 0 : index
    %160 = vector.load %arg1[%c1_107, %c0_108, %c0_109] : memref<8x2x128xf32, #tpu.memory_space<vmem>>, vector<1x2x128xf32>
    %161 = vector.shape_cast %160 : vector<1x2x128xf32> to vector<2x128xf32>
    %c1_110 = arith.constant 1 : index
    %c0_111 = arith.constant 0 : index
    %c0_112 = arith.constant 0 : index
    %162 = vector.load %arg4[%c1_110, %c0_111, %c0_112] : memref<8x2x128xf32, #tpu.memory_space<vmem>>, vector<1x2x128xf32>
    %163 = vector.shape_cast %162 : vector<1x2x128xf32> to vector<2x128xf32>
    %164 = arith.addf %161, %163 : vector<2x128xf32>
    %c6_113 = arith.constant 6 : index
    %c0_114 = arith.constant 0 : index
    %c0_115 = arith.constant 0 : index
    %c0_116 = arith.constant 0 : index
    %165 = vector.load %arg2[%c6_113, %c0_114, %c0_115, %c0_116] : memref<14x2x2x1xf32, #tpu.memory_space<vmem>>, vector<1x2x2x1xf32>
    %166 = vector.shape_cast %165 : vector<1x2x2x1xf32> to vector<2x2x1xf32>
    %167 = vector.shape_cast %164 : vector<2x128xf32> to vector<1x2x128xf32>
    %168 = vector.broadcast %167 : vector<1x2x128xf32> to vector<2x2x128xf32>
    %169 = vector.broadcast %166 : vector<2x2x1xf32> to vector<2x2x128xf32>
    %170 = arith.addf %168, %169 : vector<2x2x128xf32>
    %cst_117 = arith.constant dense<0xFF800000> : vector<2x128xf32>
    %171 = vector.multi_reduction <maximumf>, %170, %cst_117 [1] : vector<2x2x128xf32> to vector<2x128xf32>
    %172 = vector.shape_cast %171 : vector<2x128xf32> to vector<2x1x128xf32>
    %173 = vector.shape_cast %172 : vector<2x1x128xf32> to vector<2x128xf32>
    %174 = vector.broadcast %172 : vector<2x1x128xf32> to vector<2x2x128xf32>
    %175 = arith.subf %170, %174 : vector<2x2x128xf32>
    %176 = math.exp %175 : vector<2x2x128xf32>
    %cst_118 = arith.constant dense<0.000000e+00> : vector<2x128xf32>
    %177 = vector.multi_reduction <add>, %176, %cst_118 [1] : vector<2x2x128xf32> to vector<2x128xf32>
    %178 = math.log %177 : vector<2x128xf32>
    %179 = arith.addf %173, %178 : vector<2x128xf32>
    %c0_119 = arith.constant 0 : index
    %c0_120 = arith.constant 0 : index
    %c0_121 = arith.constant 0 : index
    %180 = vector.load %arg4[%c0_119, %c0_120, %c0_121] : memref<8x2x128xf32, #tpu.memory_space<vmem>>, vector<1x2x128xf32>
    %181 = vector.shape_cast %180 : vector<1x2x128xf32> to vector<2x128xf32>
    %182 = arith.addf %181, %179 : vector<2x128xf32>
    %c0_122 = arith.constant 0 : index
    %c0_123 = arith.constant 0 : index
    %c0_124 = arith.constant 0 : index
    %183 = vector.load %arg4[%c0_122, %c0_123, %c0_124] : memref<8x2x128xf32, #tpu.memory_space<vmem>>, vector<1x2x128xf32>
    %184 = vector.shape_cast %183 : vector<1x2x128xf32> to vector<2x128xf32>
    %185 = vector.shape_cast %182 : vector<2x128xf32> to vector<1x2x128xf32>
    tpu.vector_store %arg4[%c0_122, %c0_123, %c0_124], %185 {strides = array<i32>} : memref<8x2x128xf32, #tpu.memory_space<vmem>>, vector<1x2x128xf32>,
    %c0_125 = arith.constant 0 : index
    %c0_126 = arith.constant 0 : index
    %c0_127 = arith.constant 0 : index
    %186 = vector.load %arg1[%c0_125, %c0_126, %c0_127] : memref<8x2x128xf32, #tpu.memory_space<vmem>>, vector<1x2x128xf32>
    %187 = vector.shape_cast %186 : vector<1x2x128xf32> to vector<2x128xf32>
    %c0_128 = arith.constant 0 : index
    %c0_129 = arith.constant 0 : index
    %c0_130 = arith.constant 0 : index
    %188 = vector.load %arg5[%c0_128, %c0_129, %c0_130] : memref<8x2x128xf32, #tpu.memory_space<vmem>>, vector<1x2x128xf32>
    %189 = vector.shape_cast %188 : vector<1x2x128xf32> to vector<2x128xf32>
    %190 = arith.addf %187, %189 : vector<2x128xf32>
    %c7_131 = arith.constant 7 : index
    %c0_132 = arith.constant 0 : index
    %c0_133 = arith.constant 0 : index
    %c0_134 = arith.constant 0 : index
    %191 = vector.load %arg2[%c7_131, %c0_132, %c0_133, %c0_134] : memref<14x2x2x1xf32, #tpu.memory_space<vmem>>, vector<1x2x2x1xf32>
    %192 = vector.shape_cast %191 : vector<1x2x2x1xf32> to vector<2x2x1xf32>
    %193 = vector.shape_cast %190 : vector<2x128xf32> to vector<1x2x128xf32>
    %194 = vector.broadcast %193 : vector<1x2x128xf32> to vector<2x2x128xf32>
    %195 = vector.broadcast %192 : vector<2x2x1xf32> to vector<2x2x128xf32>
    %196 = arith.addf %194, %195 : vector<2x2x128xf32>
    %cst_135 = arith.constant dense<0xFF800000> : vector<2x128xf32>
    %197 = vector.multi_reduction <maximumf>, %196, %cst_135 [1] : vector<2x2x128xf32> to vector<2x128xf32>
    %198 = vector.shape_cast %197 : vector<2x128xf32> to vector<2x1x128xf32>
    %199 = vector.shape_cast %198 : vector<2x1x128xf32> to vector<2x128xf32>
    %200 = vector.broadcast %198 : vector<2x1x128xf32> to vector<2x2x128xf32>
    %201 = arith.subf %196, %200 : vector<2x2x128xf32>
    %202 = math.exp %201 : vector<2x2x128xf32>
    %cst_136 = arith.constant dense<0.000000e+00> : vector<2x128xf32>
    %203 = vector.multi_reduction <add>, %202, %cst_136 [1] : vector<2x2x128xf32> to vector<2x128xf32>
    %204 = math.log %203 : vector<2x128xf32>
    %205 = arith.addf %199, %204 : vector<2x128xf32>
    %c1_137 = arith.constant 1 : index
    %c0_138 = arith.constant 0 : index
    %c0_139 = arith.constant 0 : index
    %206 = vector.load %arg5[%c1_137, %c0_138, %c0_139] : memref<8x2x128xf32, #tpu.memory_space<vmem>>, vector<1x2x128xf32>
    %207 = vector.shape_cast %206 : vector<1x2x128xf32> to vector<2x128xf32>
    %208 = arith.addf %207, %205 : vector<2x128xf32>
    %c1_140 = arith.constant 1 : index
    %c0_141 = arith.constant 0 : index
    %c0_142 = arith.constant 0 : index
    %209 = vector.load %arg5[%c1_140, %c0_141, %c0_142] : memref<8x2x128xf32, #tpu.memory_space<vmem>>, vector<1x2x128xf32>
    %210 = vector.shape_cast %209 : vector<1x2x128xf32> to vector<2x128xf32>
    %211 = vector.shape_cast %208 : vector<2x128xf32> to vector<1x2x128xf32>
    tpu.vector_store %arg5[%c1_140, %c0_141, %c0_142], %211 {strides = array<i32>} : memref<8x2x128xf32, #tpu.memory_space<vmem>>, vector<1x2x128xf32>,
    %c0_143 = arith.constant 0 : index
    %c0_144 = arith.constant 0 : index
    %c0_145 = arith.constant 0 : index
    %212 = vector.load %arg1[%c0_143, %c0_144, %c0_145] : memref<8x2x128xf32, #tpu.memory_space<vmem>>, vector<1x2x128xf32>
    %213 = vector.shape_cast %212 : vector<1x2x128xf32> to vector<2x128xf32>
    %c0_146 = arith.constant 0 : index
    %c0_147 = arith.constant 0 : index
    %c0_148 = arith.constant 0 : index
    %214 = vector.load %arg5[%c0_146, %c0_147, %c0_148] : memref<8x2x128xf32, #tpu.memory_space<vmem>>, vector<1x2x128xf32>
    %215 = vector.shape_cast %214 : vector<1x2x128xf32> to vector<2x128xf32>
    %216 = arith.addf %213, %215 : vector<2x128xf32>
    %c8 = arith.constant 8 : index
    %c0_149 = arith.constant 0 : index
    %c0_150 = arith.constant 0 : index
    %c0_151 = arith.constant 0 : index
    %217 = vector.load %arg2[%c8, %c0_149, %c0_150, %c0_151] : memref<14x2x2x1xf32, #tpu.memory_space<vmem>>, vector<1x2x2x1xf32>
    %218 = vector.shape_cast %217 : vector<1x2x2x1xf32> to vector<2x2x1xf32>
    %219 = vector.shape_cast %216 : vector<2x128xf32> to vector<1x2x128xf32>
    %220 = vector.broadcast %219 : vector<1x2x128xf32> to vector<2x2x128xf32>
    %221 = vector.broadcast %218 : vector<2x2x1xf32> to vector<2x2x128xf32>
    %222 = arith.addf %220, %221 : vector<2x2x128xf32>
    %cst_152 = arith.constant dense<0xFF800000> : vector<2x128xf32>
    %223 = vector.multi_reduction <maximumf>, %222, %cst_152 [1] : vector<2x2x128xf32> to vector<2x128xf32>
    %224 = vector.shape_cast %223 : vector<2x128xf32> to vector<2x1x128xf32>
    %225 = vector.shape_cast %224 : vector<2x1x128xf32> to vector<2x128xf32>
    %226 = vector.broadcast %224 : vector<2x1x128xf32> to vector<2x2x128xf32>
    %227 = arith.subf %222, %226 : vector<2x2x128xf32>
    %228 = math.exp %227 : vector<2x2x128xf32>
    %cst_153 = arith.constant dense<0.000000e+00> : vector<2x128xf32>
    %229 = vector.multi_reduction <add>, %228, %cst_153 [1] : vector<2x2x128xf32> to vector<2x128xf32>
    %230 = math.log %229 : vector<2x128xf32>
    %231 = arith.addf %225, %230 : vector<2x128xf32>
    %c2_154 = arith.constant 2 : index
    %c0_155 = arith.constant 0 : index
    %c0_156 = arith.constant 0 : index
    %232 = vector.load %arg5[%c2_154, %c0_155, %c0_156] : memref<8x2x128xf32, #tpu.memory_space<vmem>>, vector<1x2x128xf32>
    %233 = vector.shape_cast %232 : vector<1x2x128xf32> to vector<2x128xf32>
    %234 = arith.addf %233, %231 : vector<2x128xf32>
    %c2_157 = arith.constant 2 : index
    %c0_158 = arith.constant 0 : index
    %c0_159 = arith.constant 0 : index
    %235 = vector.load %arg5[%c2_157, %c0_158, %c0_159] : memref<8x2x128xf32, #tpu.memory_space<vmem>>, vector<1x2x128xf32>
    %236 = vector.shape_cast %235 : vector<1x2x128xf32> to vector<2x128xf32>
    %237 = vector.shape_cast %234 : vector<2x128xf32> to vector<1x2x128xf32>
    tpu.vector_store %arg5[%c2_157, %c0_158, %c0_159], %237 {strides = array<i32>} : memref<8x2x128xf32, #tpu.memory_space<vmem>>, vector<1x2x128xf32>,
    %c1_160 = arith.constant 1 : index
    %c0_161 = arith.constant 0 : index
    %c0_162 = arith.constant 0 : index
    %238 = vector.load %arg1[%c1_160, %c0_161, %c0_162] : memref<8x2x128xf32, #tpu.memory_space<vmem>>, vector<1x2x128xf32>
    %239 = vector.shape_cast %238 : vector<1x2x128xf32> to vector<2x128xf32>
    %c1_163 = arith.constant 1 : index
    %c0_164 = arith.constant 0 : index
    %c0_165 = arith.constant 0 : index
    %240 = vector.load %arg5[%c1_163, %c0_164, %c0_165] : memref<8x2x128xf32, #tpu.memory_space<vmem>>, vector<1x2x128xf32>
    %241 = vector.shape_cast %240 : vector<1x2x128xf32> to vector<2x128xf32>
    %242 = arith.addf %239, %241 : vector<2x128xf32>
    %c9 = arith.constant 9 : index
    %c0_166 = arith.constant 0 : index
    %c0_167 = arith.constant 0 : index
    %c0_168 = arith.constant 0 : index
    %243 = vector.load %arg2[%c9, %c0_166, %c0_167, %c0_168] : memref<14x2x2x1xf32, #tpu.memory_space<vmem>>, vector<1x2x2x1xf32>
    %244 = vector.shape_cast %243 : vector<1x2x2x1xf32> to vector<2x2x1xf32>
    %245 = vector.shape_cast %242 : vector<2x128xf32> to vector<1x2x128xf32>
    %246 = vector.broadcast %245 : vector<1x2x128xf32> to vector<2x2x128xf32>
    %247 = vector.broadcast %244 : vector<2x2x1xf32> to vector<2x2x128xf32>
    %248 = arith.addf %246, %247 : vector<2x2x128xf32>
    %cst_169 = arith.constant dense<0xFF800000> : vector<2x128xf32>
    %249 = vector.multi_reduction <maximumf>, %248, %cst_169 [1] : vector<2x2x128xf32> to vector<2x128xf32>
    %250 = vector.shape_cast %249 : vector<2x128xf32> to vector<2x1x128xf32>
    %251 = vector.shape_cast %250 : vector<2x1x128xf32> to vector<2x128xf32>
    %252 = vector.broadcast %250 : vector<2x1x128xf32> to vector<2x2x128xf32>
    %253 = arith.subf %248, %252 : vector<2x2x128xf32>
    %254 = math.exp %253 : vector<2x2x128xf32>
    %cst_170 = arith.constant dense<0.000000e+00> : vector<2x128xf32>
    %255 = vector.multi_reduction <add>, %254, %cst_170 [1] : vector<2x2x128xf32> to vector<2x128xf32>
    %256 = math.log %255 : vector<2x128xf32>
    %257 = arith.addf %251, %256 : vector<2x128xf32>
    %c3_171 = arith.constant 3 : index
    %c0_172 = arith.constant 0 : index
    %c0_173 = arith.constant 0 : index
    %258 = vector.load %arg5[%c3_171, %c0_172, %c0_173] : memref<8x2x128xf32, #tpu.memory_space<vmem>>, vector<1x2x128xf32>
    %259 = vector.shape_cast %258 : vector<1x2x128xf32> to vector<2x128xf32>
    %260 = arith.addf %259, %257 : vector<2x128xf32>
    %c3_174 = arith.constant 3 : index
    %c0_175 = arith.constant 0 : index
    %c0_176 = arith.constant 0 : index
    %261 = vector.load %arg5[%c3_174, %c0_175, %c0_176] : memref<8x2x128xf32, #tpu.memory_space<vmem>>, vector<1x2x128xf32>
    %262 = vector.shape_cast %261 : vector<1x2x128xf32> to vector<2x128xf32>
    %263 = vector.shape_cast %260 : vector<2x128xf32> to vector<1x2x128xf32>
    tpu.vector_store %arg5[%c3_174, %c0_175, %c0_176], %263 {strides = array<i32>} : memref<8x2x128xf32, #tpu.memory_space<vmem>>, vector<1x2x128xf32>,
    %c1_177 = arith.constant 1 : index
    %c0_178 = arith.constant 0 : index
    %c0_179 = arith.constant 0 : index
    %264 = vector.load %arg1[%c1_177, %c0_178, %c0_179] : memref<8x2x128xf32, #tpu.memory_space<vmem>>, vector<1x2x128xf32>
    %265 = vector.shape_cast %264 : vector<1x2x128xf32> to vector<2x128xf32>
    %c1_180 = arith.constant 1 : index
    %c0_181 = arith.constant 0 : index
    %c0_182 = arith.constant 0 : index
    %266 = vector.load %arg5[%c1_180, %c0_181, %c0_182] : memref<8x2x128xf32, #tpu.memory_space<vmem>>, vector<1x2x128xf32>
    %267 = vector.shape_cast %266 : vector<1x2x128xf32> to vector<2x128xf32>
    %268 = arith.addf %265, %267 : vector<2x128xf32>
    %c10 = arith.constant 10 : index
    %c0_183 = arith.constant 0 : index
    %c0_184 = arith.constant 0 : index
    %c0_185 = arith.constant 0 : index
    %269 = vector.load %arg2[%c10, %c0_183, %c0_184, %c0_185] : memref<14x2x2x1xf32, #tpu.memory_space<vmem>>, vector<1x2x2x1xf32>
    %270 = vector.shape_cast %269 : vector<1x2x2x1xf32> to vector<2x2x1xf32>
    %271 = vector.shape_cast %268 : vector<2x128xf32> to vector<1x2x128xf32>
    %272 = vector.broadcast %271 : vector<1x2x128xf32> to vector<2x2x128xf32>
    %273 = vector.broadcast %270 : vector<2x2x1xf32> to vector<2x2x128xf32>
    %274 = arith.addf %272, %273 : vector<2x2x128xf32>
    %cst_186 = arith.constant dense<0xFF800000> : vector<2x128xf32>
    %275 = vector.multi_reduction <maximumf>, %274, %cst_186 [1] : vector<2x2x128xf32> to vector<2x128xf32>
    %276 = vector.shape_cast %275 : vector<2x128xf32> to vector<2x1x128xf32>
    %277 = vector.shape_cast %276 : vector<2x1x128xf32> to vector<2x128xf32>
    %278 = vector.broadcast %276 : vector<2x1x128xf32> to vector<2x2x128xf32>
    %279 = arith.subf %274, %278 : vector<2x2x128xf32>
    %280 = math.exp %279 : vector<2x2x128xf32>
    %cst_187 = arith.constant dense<0.000000e+00> : vector<2x128xf32>
    %281 = vector.multi_reduction <add>, %280, %cst_187 [1] : vector<2x2x128xf32> to vector<2x128xf32>
    %282 = math.log %281 : vector<2x128xf32>
    %283 = arith.addf %277, %282 : vector<2x128xf32>
    %c4_188 = arith.constant 4 : index
    %c0_189 = arith.constant 0 : index
    %c0_190 = arith.constant 0 : index
    %284 = vector.load %arg5[%c4_188, %c0_189, %c0_190] : memref<8x2x128xf32, #tpu.memory_space<vmem>>, vector<1x2x128xf32>
    %285 = vector.shape_cast %284 : vector<1x2x128xf32> to vector<2x128xf32>
    %286 = arith.addf %285, %283 : vector<2x128xf32>
    %c4_191 = arith.constant 4 : index
    %c0_192 = arith.constant 0 : index
    %c0_193 = arith.constant 0 : index
    %287 = vector.load %arg5[%c4_191, %c0_192, %c0_193] : memref<8x2x128xf32, #tpu.memory_space<vmem>>, vector<1x2x128xf32>
    %288 = vector.shape_cast %287 : vector<1x2x128xf32> to vector<2x128xf32>
    %289 = vector.shape_cast %286 : vector<2x128xf32> to vector<1x2x128xf32>
    tpu.vector_store %arg5[%c4_191, %c0_192, %c0_193], %289 {strides = array<i32>} : memref<8x2x128xf32, #tpu.memory_space<vmem>>, vector<1x2x128xf32>,
    %c2_194 = arith.constant 2 : index
    %c0_195 = arith.constant 0 : index
    %c0_196 = arith.constant 0 : index
    %290 = vector.load %arg1[%c2_194, %c0_195, %c0_196] : memref<8x2x128xf32, #tpu.memory_space<vmem>>, vector<1x2x128xf32>
    %291 = vector.shape_cast %290 : vector<1x2x128xf32> to vector<2x128xf32>
    %c2_197 = arith.constant 2 : index
    %c0_198 = arith.constant 0 : index
    %c0_199 = arith.constant 0 : index
    %292 = vector.load %arg5[%c2_197, %c0_198, %c0_199] : memref<8x2x128xf32, #tpu.memory_space<vmem>>, vector<1x2x128xf32>
    %293 = vector.shape_cast %292 : vector<1x2x128xf32> to vector<2x128xf32>
    %294 = arith.addf %291, %293 : vector<2x128xf32>
    %c11 = arith.constant 11 : index
    %c0_200 = arith.constant 0 : index
    %c0_201 = arith.constant 0 : index
    %c0_202 = arith.constant 0 : index
    %295 = vector.load %arg2[%c11, %c0_200, %c0_201, %c0_202] : memref<14x2x2x1xf32, #tpu.memory_space<vmem>>, vector<1x2x2x1xf32>
    %296 = vector.shape_cast %295 : vector<1x2x2x1xf32> to vector<2x2x1xf32>
    %297 = vector.shape_cast %294 : vector<2x128xf32> to vector<1x2x128xf32>
    %298 = vector.broadcast %297 : vector<1x2x128xf32> to vector<2x2x128xf32>
    %299 = vector.broadcast %296 : vector<2x2x1xf32> to vector<2x2x128xf32>
    %300 = arith.addf %298, %299 : vector<2x2x128xf32>
    %cst_203 = arith.constant dense<0xFF800000> : vector<2x128xf32>
    %301 = vector.multi_reduction <maximumf>, %300, %cst_203 [1] : vector<2x2x128xf32> to vector<2x128xf32>
    %302 = vector.shape_cast %301 : vector<2x128xf32> to vector<2x1x128xf32>
    %303 = vector.shape_cast %302 : vector<2x1x128xf32> to vector<2x128xf32>
    %304 = vector.broadcast %302 : vector<2x1x128xf32> to vector<2x2x128xf32>
    %305 = arith.subf %300, %304 : vector<2x2x128xf32>
    %306 = math.exp %305 : vector<2x2x128xf32>
    %cst_204 = arith.constant dense<0.000000e+00> : vector<2x128xf32>
    %307 = vector.multi_reduction <add>, %306, %cst_204 [1] : vector<2x2x128xf32> to vector<2x128xf32>
    %308 = math.log %307 : vector<2x128xf32>
    %309 = arith.addf %303, %308 : vector<2x128xf32>
    %c5_205 = arith.constant 5 : index
    %c0_206 = arith.constant 0 : index
    %c0_207 = arith.constant 0 : index
    %310 = vector.load %arg5[%c5_205, %c0_206, %c0_207] : memref<8x2x128xf32, #tpu.memory_space<vmem>>, vector<1x2x128xf32>
    %311 = vector.shape_cast %310 : vector<1x2x128xf32> to vector<2x128xf32>
    %312 = arith.addf %311, %309 : vector<2x128xf32>
    %c5_208 = arith.constant 5 : index
    %c0_209 = arith.constant 0 : index
    %c0_210 = arith.constant 0 : index
    %313 = vector.load %arg5[%c5_208, %c0_209, %c0_210] : memref<8x2x128xf32, #tpu.memory_space<vmem>>, vector<1x2x128xf32>
    %314 = vector.shape_cast %313 : vector<1x2x128xf32> to vector<2x128xf32>
    %315 = vector.shape_cast %312 : vector<2x128xf32> to vector<1x2x128xf32>
    tpu.vector_store %arg5[%c5_208, %c0_209, %c0_210], %315 {strides = array<i32>} : memref<8x2x128xf32, #tpu.memory_space<vmem>>, vector<1x2x128xf32>,
    %c2_211 = arith.constant 2 : index
    %c0_212 = arith.constant 0 : index
    %c0_213 = arith.constant 0 : index
    %316 = vector.load %arg1[%c2_211, %c0_212, %c0_213] : memref<8x2x128xf32, #tpu.memory_space<vmem>>, vector<1x2x128xf32>
    %317 = vector.shape_cast %316 : vector<1x2x128xf32> to vector<2x128xf32>
    %c2_214 = arith.constant 2 : index
    %c0_215 = arith.constant 0 : index
    %c0_216 = arith.constant 0 : index
    %318 = vector.load %arg5[%c2_214, %c0_215, %c0_216] : memref<8x2x128xf32, #tpu.memory_space<vmem>>, vector<1x2x128xf32>
    %319 = vector.shape_cast %318 : vector<1x2x128xf32> to vector<2x128xf32>
    %320 = arith.addf %317, %319 : vector<2x128xf32>
    %c12 = arith.constant 12 : index
    %c0_217 = arith.constant 0 : index
    %c0_218 = arith.constant 0 : index
    %c0_219 = arith.constant 0 : index
    %321 = vector.load %arg2[%c12, %c0_217, %c0_218, %c0_219] : memref<14x2x2x1xf32, #tpu.memory_space<vmem>>, vector<1x2x2x1xf32>
    %322 = vector.shape_cast %321 : vector<1x2x2x1xf32> to vector<2x2x1xf32>
    %323 = vector.shape_cast %320 : vector<2x128xf32> to vector<1x2x128xf32>
    %324 = vector.broadcast %323 : vector<1x2x128xf32> to vector<2x2x128xf32>
    %325 = vector.broadcast %322 : vector<2x2x1xf32> to vector<2x2x128xf32>
    %326 = arith.addf %324, %325 : vector<2x2x128xf32>
    %cst_220 = arith.constant dense<0xFF800000> : vector<2x128xf32>
    %327 = vector.multi_reduction <maximumf>, %326, %cst_220 [1] : vector<2x2x128xf32> to vector<2x128xf32>
    %328 = vector.shape_cast %327 : vector<2x128xf32> to vector<2x1x128xf32>
    %329 = vector.shape_cast %328 : vector<2x1x128xf32> to vector<2x128xf32>
    %330 = vector.broadcast %328 : vector<2x1x128xf32> to vector<2x2x128xf32>
    %331 = arith.subf %326, %330 : vector<2x2x128xf32>
    %332 = math.exp %331 : vector<2x2x128xf32>
    %cst_221 = arith.constant dense<0.000000e+00> : vector<2x128xf32>
    %333 = vector.multi_reduction <add>, %332, %cst_221 [1] : vector<2x2x128xf32> to vector<2x128xf32>
    %334 = math.log %333 : vector<2x128xf32>
    %335 = arith.addf %329, %334 : vector<2x128xf32>
    %c6_222 = arith.constant 6 : index
    %c0_223 = arith.constant 0 : index
    %c0_224 = arith.constant 0 : index
    %336 = vector.load %arg5[%c6_222, %c0_223, %c0_224] : memref<8x2x128xf32, #tpu.memory_space<vmem>>, vector<1x2x128xf32>
    %337 = vector.shape_cast %336 : vector<1x2x128xf32> to vector<2x128xf32>
    %338 = arith.addf %337, %335 : vector<2x128xf32>
    %c6_225 = arith.constant 6 : index
    %c0_226 = arith.constant 0 : index
    %c0_227 = arith.constant 0 : index
    %339 = vector.load %arg5[%c6_225, %c0_226, %c0_227] : memref<8x2x128xf32, #tpu.memory_space<vmem>>, vector<1x2x128xf32>
    %340 = vector.shape_cast %339 : vector<1x2x128xf32> to vector<2x128xf32>
    %341 = vector.shape_cast %338 : vector<2x128xf32> to vector<1x2x128xf32>
    tpu.vector_store %arg5[%c6_225, %c0_226, %c0_227], %341 {strides = array<i32>} : memref<8x2x128xf32, #tpu.memory_space<vmem>>, vector<1x2x128xf32>,
    %c3_228 = arith.constant 3 : index
    %c0_229 = arith.constant 0 : index
    %c0_230 = arith.constant 0 : index
    %342 = vector.load %arg1[%c3_228, %c0_229, %c0_230] : memref<8x2x128xf32, #tpu.memory_space<vmem>>, vector<1x2x128xf32>
    %343 = vector.shape_cast %342 : vector<1x2x128xf32> to vector<2x128xf32>
    %c3_231 = arith.constant 3 : index
    %c0_232 = arith.constant 0 : index
    %c0_233 = arith.constant 0 : index
    %344 = vector.load %arg5[%c3_231, %c0_232, %c0_233] : memref<8x2x128xf32, #tpu.memory_space<vmem>>, vector<1x2x128xf32>
    %345 = vector.shape_cast %344 : vector<1x2x128xf32> to vector<2x128xf32>
    %346 = arith.addf %343, %345 : vector<2x128xf32>
    %c13 = arith.constant 13 : index
    %c0_234 = arith.constant 0 : index
    %c0_235 = arith.constant 0 : index
    %c0_236 = arith.constant 0 : index
    %347 = vector.load %arg2[%c13, %c0_234, %c0_235, %c0_236] : memref<14x2x2x1xf32, #tpu.memory_space<vmem>>, vector<1x2x2x1xf32>
    %348 = vector.shape_cast %347 : vector<1x2x2x1xf32> to vector<2x2x1xf32>
    %349 = vector.shape_cast %346 : vector<2x128xf32> to vector<1x2x128xf32>
    %350 = vector.broadcast %349 : vector<1x2x128xf32> to vector<2x2x128xf32>
    %351 = vector.broadcast %348 : vector<2x2x1xf32> to vector<2x2x128xf32>
    %352 = arith.addf %350, %351 : vector<2x2x128xf32>
    %cst_237 = arith.constant dense<0xFF800000> : vector<2x128xf32>
    %353 = vector.multi_reduction <maximumf>, %352, %cst_237 [1] : vector<2x2x128xf32> to vector<2x128xf32>
    %354 = vector.shape_cast %353 : vector<2x128xf32> to vector<2x1x128xf32>
    %355 = vector.shape_cast %354 : vector<2x1x128xf32> to vector<2x128xf32>
    %356 = vector.broadcast %354 : vector<2x1x128xf32> to vector<2x2x128xf32>
    %357 = arith.subf %352, %356 : vector<2x2x128xf32>
    %358 = math.exp %357 : vector<2x2x128xf32>
    %cst_238 = arith.constant dense<0.000000e+00> : vector<2x128xf32>
    %359 = vector.multi_reduction <add>, %358, %cst_238 [1] : vector<2x2x128xf32> to vector<2x128xf32>
    %360 = math.log %359 : vector<2x128xf32>
    %361 = arith.addf %355, %360 : vector<2x128xf32>
    %c7_239 = arith.constant 7 : index
    %c0_240 = arith.constant 0 : index
    %c0_241 = arith.constant 0 : index
    %362 = vector.load %arg5[%c7_239, %c0_240, %c0_241] : memref<8x2x128xf32, #tpu.memory_space<vmem>>, vector<1x2x128xf32>
    %363 = vector.shape_cast %362 : vector<1x2x128xf32> to vector<2x128xf32>
    %364 = arith.addf %363, %361 : vector<2x128xf32>
    %c7_242 = arith.constant 7 : index
    %c0_243 = arith.constant 0 : index
    %c0_244 = arith.constant 0 : index
    %365 = vector.load %arg5[%c7_242, %c0_243, %c0_244] : memref<8x2x128xf32, #tpu.memory_space<vmem>>, vector<1x2x128xf32>
    %366 = vector.shape_cast %365 : vector<1x2x128xf32> to vector<2x128xf32>
    %367 = vector.shape_cast %364 : vector<2x128xf32> to vector<1x2x128xf32>
    tpu.vector_store %arg5[%c7_242, %c0_243, %c0_244], %367 {strides = array<i32>} : memref<8x2x128xf32, #tpu.memory_space<vmem>>, vector<1x2x128xf32>,
    %c0_245 = arith.constant 0 : index
    %c0_246 = arith.constant 0 : index
    %c0_247 = arith.constant 0 : index
    %368 = vector.load %arg1[%c0_245, %c0_246, %c0_247] : memref<8x2x128xf32, #tpu.memory_space<vmem>>, vector<8x2x128xf32>
    %c0_248 = arith.constant 0 : index
    %c0_249 = arith.constant 0 : index
    %c0_250 = arith.constant 0 : index
    %369 = vector.load %arg4[%c0_248, %c0_249, %c0_250] : memref<8x2x128xf32, #tpu.memory_space<vmem>>, vector<8x2x128xf32>
    %370 = arith.addf %368, %369 : vector<8x2x128xf32>
    %c0_251 = arith.constant 0 : index
    %c0_252 = arith.constant 0 : index
    %c0_253 = arith.constant 0 : index
    %371 = vector.load %arg5[%c0_251, %c0_252, %c0_253] : memref<8x2x128xf32, #tpu.memory_space<vmem>>, vector<8x2x128xf32>
    %372 = arith.addf %370, %371 : vector<8x2x128xf32>
    %cst_254 = arith.constant dense<0xFF800000> : vector<8x128xf32>
    %373 = vector.multi_reduction <maximumf>, %372, %cst_254 [1] : vector<8x2x128xf32> to vector<8x128xf32>
    %374 = vector.shape_cast %373 : vector<8x128xf32> to vector<8x1x128xf32>
    %375 = vector.broadcast %374 : vector<8x1x128xf32> to vector<8x2x128xf32>
    %376 = arith.subf %372, %375 : vector<8x2x128xf32>
    %377 = math.exp %376 : vector<8x2x128xf32>
    %cst_255 = arith.constant dense<0.000000e+00> : vector<8x128xf32>
    %378 = vector.multi_reduction <add>, %377, %cst_255 [1] : vector<8x2x128xf32> to vector<8x128xf32>
    %379 = vector.shape_cast %378 : vector<8x128xf32> to vector<8x1x128xf32>
    %380 = math.log %379 : vector<8x1x128xf32>
    %381 = arith.addf %374, %380 : vector<8x1x128xf32>
    %382 = vector.broadcast %381 : vector<8x1x128xf32> to vector<8x2x128xf32>
    %383 = arith.subf %372, %382 : vector<8x2x128xf32>
    %c0_256 = arith.constant 0 : index
    %c0_257 = arith.constant 0 : index
    %c0_258 = arith.constant 0 : index
    %384 = vector.load %arg3[%c0_256, %c0_257, %c0_258] : memref<8x2x128xf32, #tpu.memory_space<vmem>>, vector<8x2x128xf32>
    tpu.vector_store %arg3[%c0_256, %c0_257, %c0_258], %383 {strides = array<i32>} : memref<8x2x128xf32, #tpu.memory_space<vmem>>, vector<8x2x128xf32>,
    return
  }
  func.func @transform_0(%arg0: i32) -> (i32, i32, i32) {
    %c0_i32 = arith.constant 0 : i32
    %c0_i32_0 = arith.constant 0 : i32
    %c0_i32_1 = arith.constant 0 : i32
    return %c0_i32, %c0_i32_0, %arg0 : i32, i32, i32
  }
  func.func @transform_1(%arg0: i32) -> (i32, i32, i32, i32) {
    %c0_i32 = arith.constant 0 : i32
    %c0_i32_0 = arith.constant 0 : i32
    %c0_i32_1 = arith.constant 0 : i32
    %c0_i32_2 = arith.constant 0 : i32
    %c0_i32_3 = arith.constant 0 : i32
    return %c0_i32, %c0_i32_0, %c0_i32_1, %c0_i32_2 : i32, i32, i32, i32
  }
  func.func @transform_2(%arg0: i32) -> (i32, i32, i32) {
    %c0_i32 = arith.constant 0 : i32
    %c0_i32_0 = arith.constant 0 : i32
    %c0_i32_1 = arith.constant 0 : i32
    return %c0_i32, %c0_i32_0, %arg0 : i32, i32, i32
  }
}

</mosaic_0001>

<bundles_post_ra>
// kernel: tpu_custom_call.1
= control target key start
LH: loop header
LB: loop body
LE: loop exit
PB: predicated region body
PF: predicated region fallthrough
CT: control target
= control target key end

     0   :  { %v1405_v2 = vmov 0   ;;  %v1406_v9 = vmov 0.0   ;;  %s1987_s0 = inlined_call_operand.vmem [shape: f32[8,2,128], index: 0, kind: input, shape index: {}]   ;;  %s1988_s1 = inlined_call_operand.vmem [shape: f32[14,2,2,1], index: 1, kind: input, shape index: {}]   ;;  %s1989_s2 = inlined_call_operand.hbm [shape: f32[8,2,128], index: 2, kind: output, shape index: {}]  }
   0x1   :  { %v1211_v0 = vld [vmem:[%s1988_s1 + $0x1c] sm:$0x3]  ;;  %v33_v1 = vld [vmem:[%s1988_s1] sm:$0x3]  ;;  %1236 = vset.pattern.permute.xlu1 %v1405_v2  ;;  %1235 = vset.pattern.permute.xlu0 %v1405_v2  ;;  %v1212_v3 = vld [vmem:[%s1988_s1 + $0x1e] sm:$0x3] }
   0x2   :  { %506 = vperm.xlu1 %1236, %v1211_v0   ;;  %37 = vperm.xlu0 %1235, %v33_v1   ;;  %v34_v4 = vld [vmem:[%s1988_s1 + $0x2] sm:$0x3]  ;;  %v1195_v5 = vld [vmem:[%s1988_s1 + $0x6] sm:$0x3]  ;;  %v1194_v6 = vld [vmem:[%s1988_s1 + $0x4] sm:$0x3] }
   0x3   :  { %v1198_v7 = vld [vmem:[%s1988_s1 + $0xa] sm:$0x3]  ;;  %v1197_v8 = vld [vmem:[%s1988_s1 + $0x8] sm:$0x3]  ;;  %20 = vst [vmem:[#allocation3] sm:$0x3] %v1406_v9 }
   0x4   :  { %12 = vst [vmem:[#allocation2] sm:$0x3] %v1406_v9  ;;  %13 = vst [vmem:[#allocation2 + $0x2] sm:$0x3] %v1406_v9 }
   0x5   :  { %14 = vst [vmem:[#allocation2 + $0x4] sm:$0x3] %v1406_v9  ;;  %15 = vst [vmem:[#allocation2 + $0x6] sm:$0x3] %v1406_v9 }
   0x6   :  { %511 = vperm.xlu1 %1236, %v1212_v3   ;;  %42 = vperm.xlu0 %1235, %v34_v4   ;;  %16 = vst [vmem:[#allocation2 + $0x8] sm:$0x3] %v1406_v9  ;;  %17 = vst [vmem:[#allocation2 + $0xa] sm:$0x3] %v1406_v9 }
   0x7   :  { %18 = vst [vmem:[#allocation2 + $0xc] sm:$0x3] %v1406_v9  ;;  %19 = vst [vmem:[#allocation2 + $0xe] sm:$0x3] %v1406_v9 }
   0x8   :  { %21 = vst [vmem:[#allocation3 + $0x2] sm:$0x3] %v1406_v9  ;;  %22 = vst [vmem:[#allocation3 + $0x4] sm:$0x3] %v1406_v9 }
   0x9   :  { %23 = vst [vmem:[#allocation3 + $0x6] sm:$0x3] %v1406_v9  ;;  %24 = vst [vmem:[#allocation3 + $0x8] sm:$0x3] %v1406_v9 }
   0xa   :  { %112 = vperm.xlu1 %1236, %v1195_v5   ;;  %107 = vperm.xlu0 %1235, %v1194_v6   ;;  %25 = vst [vmem:[#allocation3 + $0xa] sm:$0x3] %v1406_v9  ;;  %26 = vst [vmem:[#allocation3 + $0xc] sm:$0x3] %v1406_v9 }
   0xb   :  { %27 = vst [vmem:[#allocation3 + $0xe] sm:$0x3] %v1406_v9 }
   0xc   :  { %7 = vsyncpa [#allocation5], 0  ;;  %v1201_v10 = vld [vmem:[%s1988_s1 + $0xe] sm:$0x3]  ;;  %v1200_v11 = vld [vmem:[%s1988_s1 + $0xc] sm:$0x3] }
   0xd   :  { %v1204_v12 = vld [vmem:[%s1988_s1 + $0x12] sm:$0x3]  ;;  %v1203_v13 = vld [vmem:[%s1988_s1 + $0x10] sm:$0x3]  ;;  %v1214_v14 = vld [vmem:[%s1988_s1 + $0x22] sm:$0x3] }
   0xe   :  { %180 = vperm.xlu1 %1236, %v1198_v7   ;;  %175 = vperm.xlu0 %1235, %v1197_v8   ;;  %v1213_v15 = vld [vmem:[%s1988_s1 + $0x20] sm:$0x3]  ;;  %v1217_v16 = vld [vmem:[%s1988_s1 + $0x26] sm:$0x3]  ;;  %v1216_v17 = vld [vmem:[%s1988_s1 + $0x24] sm:$0x3] }
   0xf   :  { %v1207_v18 = vld [vmem:[%s1988_s1 + $0x16] sm:$0x3]  ;;  %v1206_v19 = vld [vmem:[%s1988_s1 + $0x14] sm:$0x3]  ;;  %v1210_v20 = vld [vmem:[%s1988_s1 + $0x1a] sm:$0x3] }
  0x10   :  { %v1209_v21 = vld [vmem:[%s1988_s1 + $0x18] sm:$0x3]  ;;  %v1220_v22 = vld [vmem:[%s1988_s1 + $0x2a] sm:$0x3]  ;;  %v1219_v23 = vld [vmem:[%s1988_s1 + $0x28] sm:$0x3] }
  0x11   :  { %v1223_v24 = vld [vmem:[%s1988_s1 + $0x2e] sm:$0x3]  ;;  %v1222_v25 = vld [vmem:[%s1988_s1 + $0x2c] sm:$0x3]  ;;  %v1226_v26 = vld [vmem:[%s1988_s1 + $0x32] sm:$0x3] }
  0x12   :  { %247 = vperm.xlu1 %1236, %v1201_v10   ;;  %242 = vperm.xlu0 %1235, %v1200_v11   ;;  %v1225_v27 = vld [vmem:[%s1988_s1 + $0x30] sm:$0x3]  ;;  %v1229_v28 = vld [vmem:[%s1988_s1 + $0x36] sm:$0x3]  ;;  %v1228_v29 = vld [vmem:[%s1988_s1 + $0x34] sm:$0x3] }
  0x13   :  { %v498_v30 = vld [vmem:[%s1987_s0] sm:$0x3]  ;;  %v499_v31 = vld [vmem:[#allocation3] sm:$0x3]  ;;  %v1192_v32 = vld [vmem:[%s1987_s0 + $0xe] sm:$0x3] }
  0x14   :  { %v31_v33 = vld [vmem:[#allocation2 + $0xe] sm:$0x3]  ;;  %v500_v34 = vadd.f32 %v499_v31, %v498_v30  ;;  %vm47_vm0 = vcmask 1041408   ;;  %v1193_v40 = vld [vmem:[%s1987_s0 + $0xc] sm:$0x3]  ;;  %vm92_vm1 = vcmask 1041409  }
  0x15   :  { %v32_v35 = vadd.f32 %v1192_v32, %v31_v33  ;;  %v100_v41 = vld [vmem:[#allocation2 + $0xc] sm:$0x3]  ;;  %v1196_v53 = vld [vmem:[%s1987_s0 + $0xa] sm:$0x3]  ;;  %v1199_v55 = vld [vmem:[%s1987_s0 + $0x8] sm:$0x3] }
  0x16   :  { %314 = vperm.xlu1 %1236, %v1204_v12   ;;  %309 = vperm.xlu0 %1235, %v1203_v13   ;;  %v101_v50 = vadd.f32 %v1193_v40, %v100_v41  ;;  %v168_v54 = vld [vmem:[#allocation2 + $0xa] sm:$0x3]  ;;  %v235_v58 = vld [vmem:[#allocation2 + $0x8] sm:$0x3]  ;;  %v564_v59 = vld [vmem:[%s1987_s0] sm:$0x3] }
  0x17   :  { %v565_v2 = vld [vmem:[#allocation3] sm:$0x3]  ;;  %v169_v5 = vadd.f32 %v1196_v53, %v168_v54  ;;  %v236_v12 = vadd.f32 %v1199_v55, %v235_v58 }
  0x18   :  { %v1551_v13 = vadd.f32 %v565_v2, %v564_v59 }
  0x1a   :  { %577 = vperm.xlu1 %1236, %v1214_v14   ;;  %572 = vperm.xlu0 %1235, %v1213_v15  }
  0x1e   :  { %643 = vperm.xlu1 %1236, %v1217_v16   ;;  %638 = vperm.xlu0 %1235, %v1216_v17  }
  0x22   :  { %380 = vperm.xlu1 %1236, %v1207_v18   ;;  %375 = vperm.xlu0 %1235, %v1206_v19  }
  0x26   :  { %446 = vperm.xlu1 %1236, %v1210_v20   ;;  %441 = vperm.xlu0 %1235, %v1209_v21  }
  0x2a   :  { %709 = vperm.xlu1 %1236, %v1220_v22   ;;  %704 = vperm.xlu0 %1235, %v1219_v23  }
  0x2e   :  { %775 = vperm.xlu1 %1236, %v1223_v24   ;;  %770 = vperm.xlu0 %1235, %v1222_v25  }
  0x32   :  { %841 = vperm.xlu1 %1236, %v1226_v26   ;;  %836 = vperm.xlu0 %1235, %v1225_v27  }
  0x36   :  { %907 = vperm.xlu1 %1236, %v1229_v28   ;;  %902 = vperm.xlu0 %1235, %v1228_v29  }
  0x81   :  { %v507_v36 = vpop.permute.xlu1 %506  ;;  %v38_v37 = vpop.permute.xlu0 %37 }
  0x82   :  { %v1515_v38 = vadd.f32 %v507_v36, %v500_v34  ;;  %v1517_v39 = vadd.f32 %v38_v37, %v32_v35 }
  0x84   :  { %v516_v42 = vsel %vm47_vm0, %v1515_v38, -inf  ;;  %v48_v43 = vsel %vm47_vm0, %v1517_v39, -inf }
  0x85   :  { %v517_v44 = vrot.slane %v516_v42, 4  ;;  %v49_v45 = vrot.slane %v48_v43, 4  ;;  %v512_v46 = vpop.permute.xlu1 %511  ;;  %v43_v47 = vpop.permute.xlu0 %42 }
  0x86   :  { %v1526_v48 = vadd.f32 %v512_v46, %v500_v34  ;;  %v1528_v49 = vadd.f32 %v43_v47, %v32_v35 }
  0x87   :  { %v518_v51 = vmax.f32 %v516_v42, %v517_v44  ;;  %v50_v52 = vmax.f32 %v48_v43, %v49_v45 }
  0x88   :  { %v523_v56 = vsel %vm47_vm0, %v1526_v48, -inf  ;;  %v55_v57 = vsel %vm47_vm0, %v1528_v49, -inf }
  0x89   :  { %v519_v60 = vrot.slane %v518_v51, 2  ;;  %v51_v61 = vrot.slane %v50_v52, 2  ;;  %v524_v62 = vrot.slane %v523_v56, 4  ;;  %v56_v63 = vrot.slane %v55_v57, 4  ;;  %v113_v0 = vpop.permute.xlu1 %112  ;;  %v108_v1 = vpop.permute.xlu0 %107 }
  0x8a   :  { %v1543_v3 = vadd.f32 %v113_v0, %v101_v50  ;;  %v1545_v4 = vadd.f32 %v108_v1, %v101_v50 }
  0x8b   :  { %v520_v6 = vmax.f32 %v518_v51, %v519_v60  ;;  %v52_v7 = vmax.f32 %v50_v52, %v51_v61  ;;  %v525_v8 = vmax.f32 %v523_v56, %v524_v62  ;;  %v57_v9 = vmax.f32 %v55_v57, %v56_v63 }
  0x8c   :  { %v124_v10 = vsel %vm47_vm0, %v1543_v3, -inf  ;;  %v117_v11 = vsel %vm47_vm0, %v1545_v4, -inf }
  0x8d   :  { %v521_v14 = vrot.slane %v520_v6, 1  ;;  %v53_v15 = vrot.slane %v52_v7, 1  ;;  %v526_v16 = vrot.slane %v525_v8, 2  ;;  %v58_v17 = vrot.slane %v57_v9, 2  ;;  %v181_v18 = vpop.permute.xlu1 %180  ;;  %v176_v19 = vpop.permute.xlu0 %175 }
  0x8e   :  { %v125_v20 = vrot.slane %v124_v10, 4  ;;  %v118_v21 = vrot.slane %v117_v11, 4  ;;  %v1553_v22 = vadd.f32 %v181_v18, %v169_v5  ;;  %v1555_v23 = vadd.f32 %v176_v19, %v169_v5 }
  0x8f   :  { %v1557_v24 = vmax.f32 %v520_v6, %v521_v14  ;;  %v1559_v25 = vmax.f32 %v52_v7, %v53_v15  ;;  %v527_v26 = vmax.f32 %v525_v8, %v526_v16  ;;  %v59_v27 = vmax.f32 %v57_v9, %v58_v17 }
  0x90   :  { %v126_v28 = vmax.f32 %v124_v10, %v125_v20  ;;  %v119_v29 = vmax.f32 %v117_v11, %v118_v21  ;;  %v192_v30 = vsel %vm47_vm0, %v1553_v22, -inf  ;;  %v185_v31 = vsel %vm47_vm0, %v1555_v23, -inf }
  0x91   :  { %v530_v32 = vsub.f32 %v1515_v38, %v1557_v24  ;;  %v62_v33 = vsub.f32 %v1517_v39, %v1559_v25  ;;  %v528_v34 = vrot.slane %v527_v26, 1  ;;  %v60_v35 = vrot.slane %v59_v27, 1  ;;  %v248_v36 = vpop.permute.xlu1 %247  ;;  %v243_v37 = vpop.permute.xlu0 %242 }
  0x92   :  { %v127_v40 = vrot.slane %v126_v28, 2  ;;  %v120_v41 = vrot.slane %v119_v29, 2  ;;  %v193_v42 = vrot.slane %v192_v30, 4  ;;  %v186_v43 = vrot.slane %v185_v31, 4 }
  0x93   :  { %v532_v44 = vmul.f32 1.442695, %v530_v32  ;;  %v64_v45 = vmul.f32 1.442695, %v62_v33  ;;  %v1569_v46 = vmax.f32 %v527_v26, %v528_v34  ;;  %v1571_v47 = vmax.f32 %v59_v27, %v60_v35 }
  0x94   :  { %v128_v50 = vmax.f32 %v126_v28, %v127_v40  ;;  %v121_v51 = vmax.f32 %v119_v29, %v120_v41  ;;  %v194_v38 = vmax.f32 %v192_v30, %v193_v42  ;;  %v187_v52 = vmax.f32 %v185_v31, %v186_v43 }
  0x95   :  { %1237 = vpow2.f32 %v532_v44  ;;  %v531_v39 = vsub.f32 %v1526_v48, %v1569_v46  ;;  %v63_v53 = vsub.f32 %v1528_v49, %v1571_v47  ;;  %v1577_v54 = vadd.f32 %v248_v36, %v236_v12  ;;  %v1579_v55 = vpop.permute.xlu1 %314  ;;  %v1581_v56 = vpop.permute.xlu0 %309 }
  0x96   :  { %1239 = vpow2.f32 %v64_v45  ;;  %v129_v57 = vrot.slane %v128_v50, 1  ;;  %v122_v58 = vrot.slane %v121_v51, 1  ;;  %v195_v59 = vrot.slane %v194_v38, 2 }
  0x97   :  { %v534_v60 = vmul.f32 1.442695, %v531_v39  ;;  %v66_v61 = vmul.f32 1.442695, %v63_v53  ;;  %v188_v62 = vrot.slane %v187_v52, 2  ;;  %v259_v63 = vsel %vm47_vm0, %v1577_v54, -inf }
  0x98   :  { %v1585_v48 = vmax.f32 %v128_v50, %v129_v57  ;;  %v1587_v0 = vmax.f32 %v121_v51, %v122_v58  ;;  %v196_v49 = vmax.f32 %v194_v38, %v195_v59  ;;  %v260_v1 = vrot.slane %v259_v63, 4 }
  0x99   :  { %1241 = vpow2.f32 %v534_v60  ;;  %v189_v2 = vmax.f32 %v187_v52, %v188_v62  ;;  %v1589_v5 = vadd.f32 %v243_v37, %v236_v12  ;;  %v578_v6 = vpop.permute.xlu1 %577  ;;  %v573_v10 = vpop.permute.xlu0 %572 }
  0x9a   :  { %1243 = vpow2.f32 %v66_v61  ;;  %v132_v7 = vsub.f32 %v1543_v3, %v1585_v48  ;;  %v131_v8 = vsub.f32 %v1545_v4, %v1587_v0  ;;  %v197_v9 = vrot.slane %v196_v49, 1 }
  0x9b   :  { %v190_v11 = vrot.slane %v189_v2, 1  ;;  %v261_v14 = vmax.f32 %v259_v63, %v260_v1  ;;  %v252_v15 = vsel %vm47_vm0, %v1589_v5, -inf  ;;  %v1598_v16 = vadd.f32 %v578_v6, %v1551_v13 }
  0x9c   :  { %v135_v12 = vmul.f32 1.442695, %v132_v7  ;;  %v133_v17 = vmul.f32 1.442695, %v131_v8  ;;  %v1600_v18 = vmax.f32 %v196_v49, %v197_v9  ;;  %v253_v19 = vrot.slane %v252_v15, 4 }
  0x9d   :  { %v1602_v20 = vmax.f32 %v189_v2, %v190_v11  ;;  %v262_v3 = vrot.slane %v261_v14, 2  ;;  %v589_v4 = vsel %vm47_vm0, %v1598_v16, -inf  ;;  %v1607_v21 = vadd.f32 %v573_v10, %v1551_v13 }
  0x9e   :  { %1245 = vpow2.f32 %v135_v12  ;;  %v200_v26 = vsub.f32 %v1553_v22, %v1600_v18  ;;  %v254_v27 = vmax.f32 %v252_v15, %v253_v19  ;;  %v590_v28 = vrot.slane %v589_v4, 4 }
  0x9f   :  { %v1238_v29 = vpop.eup %1237  ;;  %1247 = vpow2.f32 %v133_v17  ;;  %v199_v30 = vsub.f32 %v1555_v23, %v1602_v20  ;;  %v263_v31 = vmax.f32 %v261_v14, %v262_v3  ;;  %v582_v32 = vsel %vm47_vm0, %v1607_v21, -inf }
  0xa0   :  { %v1240_v33 = vpop.eup %1239  ;;  %v536_v34 = vsel %vm47_vm0, %v1238_v29, 0.0  ;;  %v203_v13 = vmul.f32 1.442695, %v200_v26  ;;  %v255_v35 = vrot.slane %v254_v27, 2  ;;  %v591_v36 = vmax.f32 %v589_v4, %v590_v28 }
  0xa1   :  { %v537_v37 = vrot.slane %v536_v34, 4  ;;  %v68_v22 = vsel %vm47_vm0, %v1240_v33, 0.0  ;;  %v201_v40 = vmul.f32 1.442695, %v199_v30  ;;  %v264_v41 = vrot.slane %v263_v31, 1 }
  0xa2   :  { %v69_v42 = vrot.slane %v68_v22, 4  ;;  %1249 = vpow2.f32 %v203_v13  ;;  %v256_v43 = vmax.f32 %v254_v27, %v255_v35  ;;  %v592_v44 = vrot.slane %v591_v36, 2 }
  0xa3   :  { %v1242_v23 = vpop.eup %1241  ;;  %v538_v45 = vadd.f32 %v537_v37, %v536_v34  ;;  %1251 = vpow2.f32 %v201_v40  ;;  %v1617_v50 = vmax.f32 %v263_v31, %v264_v41  ;;  %v583_v51 = vrot.slane %v582_v32, 4 }
  0xa4   :  { %v1244_v38 = vpop.eup %1243  ;;  %v70_v52 = vadd.f32 %v69_v42, %v68_v22  ;;  %v543_v39 = vsel %vm47_vm0, %v1242_v23, 0.0  ;;  %v257_v53 = vrot.slane %v256_v43, 1  ;;  %v593_v57 = vmax.f32 %v591_v36, %v592_v44 }
  0xa5   :  { %v539_v58 = vrot.slane %v538_v45, 2  ;;  %v544_v59 = vrot.slane %v543_v39, 4  ;;  %v75_v60 = vsel %vm47_vm0, %v1244_v38, 0.0  ;;  %v267_v61 = vsub.f32 %v1577_v54, %v1617_v50 }
  0xa6   :  { %v71_v62 = vrot.slane %v70_v52, 2  ;;  %v76_v63 = vrot.slane %v75_v60, 4  ;;  %v1623_v49 = vmax.f32 %v256_v43, %v257_v53  ;;  %v594_v1 = vrot.slane %v593_v57, 1 }
  0xa7   :  { %v540_v2 = vadd.f32 %v539_v58, %v538_v45  ;;  %v545_v6 = vadd.f32 %v544_v59, %v543_v39  ;;  %v270_v7 = vmul.f32 1.442695, %v267_v61  ;;  %v584_v8 = vmax.f32 %v582_v32, %v583_v51 }
  0xa8   :  { %v1246_v9 = vpop.eup %1245  ;;  %v72_v10 = vadd.f32 %v71_v62, %v70_v52  ;;  %v77_v11 = vadd.f32 %v76_v63, %v75_v60  ;;  %v266_v14 = vsub.f32 %v1589_v5, %v1623_v49  ;;  %v1627_v15 = vmax.f32 %v593_v57, %v594_v1 }
  0xa9   :  { %v1248_v12 = vpop.eup %1247  ;;  %v541_v17 = vrot.slane %v540_v2, 1  ;;  %v546_v54 = vrot.slane %v545_v6, 2  ;;  %v144_v19 = vsel %vm47_vm0, %v1246_v9, 0.0  ;;  %1253 = vpow2.f32 %v270_v7 }
  0xaa   :  { %v73_v3 = vrot.slane %v72_v10, 1  ;;  %v78_v4 = vrot.slane %v77_v11, 2  ;;  %v145_v26 = vrot.slane %v144_v19, 4  ;;  %v137_v27 = vsel %vm47_vm0, %v1248_v12, 0.0 }
  0xab   :  { %v542_v28 = vadd.f32 %v541_v17, %v540_v2  ;;  %v547_v29 = vadd.f32 %v546_v54, %v545_v6  ;;  %v138_v30 = vrot.slane %v137_v27, 4  ;;  %v268_v31 = vmul.f32 1.442695, %v266_v14 }
  0xac   :  { %v1250_v32 = vpop.eup %1249  ;;  %v74_v33 = vadd.f32 %v73_v3, %v72_v10  ;;  %v79_v5 = vadd.f32 %v78_v4, %v77_v11  ;;  %v146_v34 = vadd.f32 %v145_v26, %v144_v19  ;;  %v597_v13 = vsub.f32 %v1598_v16, %v1627_v15 }
  0xad   :  { %v1252_v35 = vpop.eup %1251  ;;  %1255 = vlog2.f32 %v542_v28  ;;  %v548_v36 = vrot.slane %v547_v29, 1  ;;  %v139_v37 = vadd.f32 %v138_v30, %v137_v27  ;;  %v212_v22 = vsel %vm47_vm0, %v1250_v32, 0.0  ;;  %v1641_v32 = vpop.permute.xlu1 %643 }
  0xae   :  { %1257 = vlog2.f32 %v74_v33  ;;  %v80_v40 = vrot.slane %v79_v5, 1  ;;  %v147_v41 = vrot.slane %v146_v34, 2  ;;  %v213_v42 = vrot.slane %v212_v22, 4 }
  0xaf   :  { %v549_v43 = vadd.f32 %v548_v36, %v547_v29  ;;  %v140_v44 = vrot.slane %v139_v37, 2  ;;  %v205_v23 = vsel %vm47_vm0, %v1252_v35, 0.0  ;;  %1259 = vpow2.f32 %v268_v31  ;;  %v1643_v35 = vpop.permute.xlu0 %638 }
  0xb0   :  { %v81_v45 = vadd.f32 %v80_v40, %v79_v5  ;;  %v148_v51 = vadd.f32 %v147_v41, %v146_v34  ;;  %v214_v38 = vadd.f32 %v213_v42, %v212_v22  ;;  %v206_v52 = vrot.slane %v205_v23, 4 }
  0xb1   :  { %1261 = vlog2.f32 %v549_v43  ;;  %v141_v16 = vadd.f32 %v140_v44, %v139_v37  ;;  %v600_v39 = vmul.f32 1.442695, %v597_v13  ;;  %v585_v53 = vrot.slane %v584_v8, 2 }
  0xb2   :  { %1263 = vlog2.f32 %v81_v45  ;;  %v149_v57 = vrot.slane %v148_v51, 1  ;;  %v215_v58 = vrot.slane %v214_v38, 2  ;;  %v207_v59 = vadd.f32 %v206_v52, %v205_v23  ;;  %v557_v23 = vld [vmem:[#allocation3 + $0x2] sm:$0x3] }
  0xb3   :  { %v1254_v60 = vpop.eup %1253  ;;  %v142_v61 = vrot.slane %v141_v16, 1  ;;  %1265 = vpow2.f32 %v600_v39  ;;  %v586_v62 = vmax.f32 %v584_v8, %v585_v53 }
  0xb4   :  { %v150_v63 = vadd.f32 %v149_v57, %v148_v51  ;;  %v216_v1 = vadd.f32 %v215_v58, %v214_v38  ;;  %v208_v2 = vrot.slane %v207_v59, 2  ;;  %v279_v6 = vsel %vm47_vm0, %v1254_v60, 0.0  ;;  %v89_v38 = vld [vmem:[#allocation2 + $0x6] sm:$0x3]  ;;  %v1651_v58 = vpop.permute.xlu1 %380 }
  0xb5   :  { %v143_v7 = vadd.f32 %v142_v61, %v141_v16  ;;  %v280_v9 = vrot.slane %v279_v6, 4  ;;  %v587_v10 = vrot.slane %v586_v62, 1 }
  0xb6   :  { %1267 = vlog2.f32 %v150_v63  ;;  %v217_v11 = vrot.slane %v216_v1, 1  ;;  %v209_v14 = vadd.f32 %v208_v2, %v207_v59 }
  0xb7   :  { %v1256_v12 = vpop.eup %1255  ;;  %1269 = vlog2.f32 %v143_v7  ;;  %v281_v17 = vadd.f32 %v280_v9, %v279_v6  ;;  %v1636_v54 = vmax.f32 %v586_v62, %v587_v10  ;;  %v158_v7 = vld [vmem:[#allocation2 + $0x4] sm:$0x3] }
  0xb8   :  { %v1258_v19 = vpop.eup %1257  ;;  %v218_v3 = vadd.f32 %v217_v11, %v216_v1  ;;  %v210_v4 = vrot.slane %v209_v14, 1  ;;  %v551_v26 = vmul.f32 0.6931472, %v1256_v12 }
  0xb9   :  { %v1260_v8 = vpop.eup %1259  ;;  %v282_v27 = vrot.slane %v281_v17, 2  ;;  %v596_v28 = vsub.f32 %v1607_v21, %v1636_v54  ;;  %v83_v29 = vmul.f32 0.6931472, %v1258_v19 }
  0xba   :  { %1271 = vlog2.f32 %v218_v3  ;;  %v211_v30 = vadd.f32 %v210_v4, %v209_v14  ;;  %v272_v31 = vsel %vm47_vm0, %v1260_v8, 0.0  ;;  %v554_v42 = vadd.f32 %v551_v26, %v1557_v24  ;;  %v1659_v3 = vpop.permute.xlu1 %446 }
  0xbb   :  { %v1262_v33 = vpop.eup %1261  ;;  %v283_v5 = vadd.f32 %v282_v27, %v281_v17  ;;  %v273_v34 = vrot.slane %v272_v31, 4  ;;  %v598_v13 = vmul.f32 1.442695, %v596_v28  ;;  %v86_v43 = vadd.f32 %v83_v29, %v1559_v25  ;;  %v1215_v29 = vld [vmem:[%s1987_s0 + $0x2] sm:$0x3] }
  0xbc   :  { %v1264_v36 = vpop.eup %1263  ;;  %v553_v37 = vmul.f32 0.6931472, %v1262_v33  ;;  %1273 = vlog2.f32 %v211_v30  ;;  %v1218_v30 = vld [vmem:[%s1987_s0 + $0x2] sm:$0x3]  ;;  %v1202_v33 = vld [vmem:[%s1987_s0 + $0x6] sm:$0x3] }
  0xbd   :  { %v1266_v22 = vpop.eup %1265  ;;  %v85_v40 = vmul.f32 0.6931472, %v1264_v36  ;;  %v284_v21 = vrot.slane %v283_v5, 1  ;;  %v274_v41 = vadd.f32 %v273_v34, %v272_v31  ;;  %1275 = vpow2.f32 %v598_v13 }
  0xbe   :  { %v555_v44 = vadd.f32 %v553_v37, %v1569_v46  ;;  %v609_v45 = vsel %vm47_vm0, %v1266_v22, 0.0  ;;  %v1654_v46 = vpop.permute.xlu0 %375 }
  0xbf   :  { %v87_v51 = vadd.f32 %v85_v40, %v1571_v47  ;;  %v285_v52 = vadd.f32 %v284_v21, %v283_v5  ;;  %v275_v16 = vrot.slane %v274_v41, 2  ;;  %v610_v39 = vrot.slane %v609_v45, 4 }
  0xc0   :  { %v1268_v53 = vpop.eup %1267  ;;  %v560_v57 = vsel %vm92_vm1, %v555_v44, %v554_v42  ;;  %v710_v44 = vpop.permute.xlu1 %709 }
  0xc1   :  { %v1270_v59 = vpop.eup %1269  ;;  %v562_v24 = vadd.f32 %v560_v57, %v557_v23  ;;  %v93_v25 = vsel %vm92_vm1, %v87_v51, %v86_v43  ;;  %v154_v60 = vmul.f32 0.6931472, %v1268_v53  ;;  %1277 = vlog2.f32 %v285_v52 }
  0xc2   :  { %v95_v61 = vadd.f32 %v93_v25, %v89_v38  ;;  %v152_v62 = vmul.f32 0.6931472, %v1270_v59  ;;  %v276_v47 = vadd.f32 %v275_v16, %v274_v41  ;;  %v611_v63 = vadd.f32 %v610_v39, %v609_v45  ;;  %v1661_v27 = vpop.permute.xlu0 %441 }
  0xc3   :  { %563 = vst [vmem:[#allocation3 + $0x2] sm:$0x3] %v562_v24  ;;  %v156_v1 = vadd.f32 %v154_v60, %v1585_v48 }
  0xc4   :  { %v1272_v2 = vpop.eup %1271  ;;  %96 = vst [vmem:[#allocation2 + $0x6] sm:$0x3] %v95_v61  ;;  %v155_v6 = vadd.f32 %v152_v62, %v1587_v0  ;;  %v277_v9 = vrot.slane %v276_v47, 1  ;;  %v612_v10 = vrot.slane %v611_v63, 2 }
  0xc5   :  { %v222_v11 = vmul.f32 0.6931472, %v1272_v2 }
  0xc6   :  { %v1274_v14 = vpop.eup %1273  ;;  %v161_v12 = vsel %vm92_vm1, %v156_v1, %v155_v6  ;;  %v278_v17 = vadd.f32 %v277_v9, %v276_v47  ;;  %v613_v19 = vadd.f32 %v612_v10, %v611_v63  ;;  %v705_v38 = vpop.permute.xlu0 %704 }
  0xc7   :  { %v1276_v4 = vpop.eup %1275  ;;  %v163_v8 = vadd.f32 %v161_v12, %v158_v7  ;;  %v220_v26 = vmul.f32 0.6931472, %v1274_v14  ;;  %v224_v48 = vadd.f32 %v222_v11, %v1600_v18 }
  0xc8   :  { %1279 = vlog2.f32 %v278_v17  ;;  %v614_v0 = vrot.slane %v613_v19, 1  ;;  %v602_v28 = vsel %vm47_vm0, %v1276_v4, 0.0 }
  0xc9   :  { %164 = vst [vmem:[#allocation2 + $0x4] sm:$0x3] %v163_v8  ;;  %v223_v31 = vadd.f32 %v220_v26, %v1602_v20  ;;  %v603_v18 = vrot.slane %v602_v28, 4  ;;  %v293_v26 = vld [vmem:[#allocation2 + $0x2] sm:$0x3] }
  0xca   :  { %v615_v5 = vadd.f32 %v614_v0, %v613_v19  ;;  %v631_v34 = vld [vmem:[#allocation3 + $0x2] sm:$0x3] }
  0xcb   :  { %v697_v13 = vld [vmem:[#allocation3 + $0x2] sm:$0x3]  ;;  %v1278_v36 = vpop.eup %1277  ;;  %v302_v37 = vld [vmem:[#allocation2 + $0x6] sm:$0x3]  ;;  %v604_v22 = vadd.f32 %v603_v18, %v602_v28  ;;  %v632_v40 = vadd.f32 %v1215_v29, %v631_v34  ;;  %v228_v41 = vsel %vm92_vm1, %v224_v48, %v223_v31 }
  0xcc   :  { %v698_v21 = vadd.f32 %v1218_v30, %v697_v13  ;;  %v289_v42 = vmul.f32 0.6931472, %v1278_v36  ;;  %v303_v43 = vadd.f32 %v1202_v33, %v302_v37  ;;  %1281 = vlog2.f32 %v615_v5 }
  0xcd   :  { %v605_v20 = vrot.slane %v604_v22, 2  ;;  %v1677_v23 = vadd.f32 %v1641_v32, %v632_v40  ;;  %v1680_v45 = vadd.f32 %v1643_v35, %v632_v40 }
  0xce   :  { %v1682_v51 = vadd.f32 %v710_v44, %v698_v21  ;;  %v291_v52 = vadd.f32 %v289_v42, %v1617_v50  ;;  %v1686_v16 = vadd.f32 %v1579_v55, %v303_v43  ;;  %v1689_v39 = vadd.f32 %v1581_v56, %v303_v43 }
  0xcf   :  { %v1691_v53 = vadd.f32 %v705_v38, %v698_v21  ;;  %v606_v57 = vadd.f32 %v605_v20, %v604_v22  ;;  %v655_v32 = vsel %vm47_vm0, %v1677_v23, -inf  ;;  %v648_v35 = vsel %vm47_vm0, %v1680_v45, -inf }
  0xd0   :  { %v721_v59 = vsel %vm47_vm0, %v1682_v51, -inf  ;;  %v225_v24 = vld [vmem:[#allocation2 + $0x4] sm:$0x3]  ;;  %v326_v55 = vsel %vm47_vm0, %v1686_v16, -inf  ;;  %v319_v56 = vsel %vm47_vm0, %v1689_v39, -inf  ;;  %v656_v50 = vrot.slane %v655_v32, 4 }
  0xd1   :  { %v649_v25 = vrot.slane %v648_v35, 4  ;;  %v230_v60 = vadd.f32 %v228_v41, %v225_v24  ;;  %v327_v61 = vrot.slane %v326_v55, 4  ;;  %v320_v62 = vrot.slane %v319_v56, 4 }
  0xd2   :  { %v607_v47 = vrot.slane %v606_v57, 1  ;;  %v1280_v63 = vpop.eup %1279  ;;  %v657_v1 = vmax.f32 %v655_v32, %v656_v50  ;;  %v722_v6 = vrot.slane %v721_v59, 4  ;;  %v714_v7 = vsel %vm47_vm0, %v1691_v53, -inf }
  0xd3   :  { %v650_v2 = vmax.f32 %v648_v35, %v649_v25  ;;  %231 = vst [vmem:[#allocation2 + $0x4] sm:$0x3] %v230_v60  ;;  %v287_v9 = vmul.f32 0.6931472, %v1280_v63  ;;  %v328_v10 = vmax.f32 %v326_v55, %v327_v61  ;;  %v321_v11 = vmax.f32 %v319_v56, %v320_v62 }
  0xd4   :  { %v608_v14 = vadd.f32 %v607_v47, %v606_v57  ;;  %v658_v12 = vrot.slane %v657_v1, 2  ;;  %v723_v19 = vmax.f32 %v721_v59, %v722_v6  ;;  %v715_v4 = vrot.slane %v714_v7, 4 }
  0xd5   :  { %v651_v17 = vrot.slane %v650_v2, 2  ;;  %v290_v8 = vadd.f32 %v287_v9, %v1623_v49  ;;  %v329_v48 = vrot.slane %v328_v10, 2  ;;  %v322_v0 = vrot.slane %v321_v11, 2  ;;  %v1205_v49 = vld [vmem:[%s1987_s0 + $0x4] sm:$0x3] }
  0xd6   :  { %1283 = vlog2.f32 %v608_v14  ;;  %v1282_v28 = vpop.eup %1281  ;;  %v659_v29 = vmax.f32 %v657_v1, %v658_v12  ;;  %v724_v31 = vrot.slane %v723_v19, 2  ;;  %v716_v33 = vmax.f32 %v714_v7, %v715_v4 }
  0xd7   :  { %v652_v30 = vmax.f32 %v650_v2, %v651_v17  ;;  %v296_v18 = vsel %vm92_vm1, %v291_v52, %v290_v8  ;;  %v330_v5 = vmax.f32 %v328_v10, %v329_v48  ;;  %v323_v34 = vmax.f32 %v321_v11, %v322_v0 }
  0xd8   :  { %v619_v13 = vmul.f32 0.6931472, %v1282_v28  ;;  %v298_v36 = vadd.f32 %v296_v18, %v293_v26  ;;  %v660_v37 = vrot.slane %v659_v29, 1  ;;  %v725_v40 = vmax.f32 %v723_v19, %v724_v31 }
  0xd9   :  { %v653_v22 = vrot.slane %v652_v30, 1  ;;  %v331_v21 = vrot.slane %v330_v5, 1  ;;  %v324_v41 = vrot.slane %v323_v34, 1  ;;  %v717_v42 = vrot.slane %v716_v33, 2 }
  0xda   :  { %299 = vst [vmem:[#allocation2 + $0x2] sm:$0x3] %v298_v36  ;;  %v1710_v43 = vmax.f32 %v659_v29, %v660_v37  ;;  %v368_v20 = vld [vmem:[#allocation2 + $0x4] sm:$0x3]  ;;  %v726_v38 = vrot.slane %v725_v40, 1  ;;  %v621_v59 = vadd.f32 %v619_v13, %v1627_v15 }
  0xdb   :  { %v1712_v44 = vmax.f32 %v652_v30, %v653_v22  ;;  %v1714_v52 = vmax.f32 %v330_v5, %v331_v21  ;;  %v1716_v57 = vmax.f32 %v323_v34, %v324_v41  ;;  %v369_v32 = vadd.f32 %v1205_v49, %v368_v20  ;;  %v970_v31 = vld [vmem:[#allocation2 + $0x4] sm:$0x3] }
  0xdc   :  { %v718_v35 = vmax.f32 %v716_v33, %v717_v42  ;;  %v663_v24 = vsub.f32 %v1677_v23, %v1710_v43  ;;  %v1723_v56 = vmax.f32 %v725_v40, %v726_v38  ;;  %v1221_v21 = vld [vmem:[%s1987_s0 + $0x4] sm:$0x3] }
  0xdd   :  { %v662_v55 = vsub.f32 %v1680_v45, %v1712_v44  ;;  %v334_v50 = vsub.f32 %v1686_v16, %v1714_v52  ;;  %v333_v25 = vsub.f32 %v1689_v39, %v1716_v57  ;;  %v384_v60 = vadd.f32 %v1651_v58, %v369_v32 }
  0xde   :  { %v383_v61 = vadd.f32 %v1654_v46, %v369_v32  ;;  %v666_v62 = vmul.f32 1.442695, %v663_v24  ;;  %v729_v23 = vsub.f32 %v1682_v51, %v1723_v56  ;;  %v719_v47 = vrot.slane %v718_v35, 1  ;;  %v623_v51 = vld [vmem:[#allocation3 + $0x4] sm:$0x3] }
  0xdf   :  { %v664_v15 = vmul.f32 1.442695, %v662_v55  ;;  %v337_v45 = vmul.f32 1.442695, %v334_v50  ;;  %v335_v1 = vmul.f32 1.442695, %v333_v25 }
  0xe0   :  { %v1284_v63 = vpop.eup %1283  ;;  %v392_v2 = vsel %vm47_vm0, %v384_v60, -inf  ;;  %v385_v16 = vsel %vm47_vm0, %v383_v61, -inf  ;;  %1285 = vpow2.f32 %v666_v62  ;;  %v732_v58 = vmul.f32 1.442695, %v729_v23 }
  0xe1   :  { %v617_v6 = vmul.f32 0.6931472, %v1284_v63  ;;  %v393_v39 = vrot.slane %v392_v2, 4  ;;  %v386_v7 = vrot.slane %v385_v16, 4  ;;  %1287 = vpow2.f32 %v337_v45 }
  0xe2   :  { %v1735_v46 = vmax.f32 %v718_v35, %v719_v47  ;;  %1289 = vpow2.f32 %v335_v1 }
  0xe3   :  { %v620_v9 = vadd.f32 %v617_v6, %v1636_v54  ;;  %v394_v10 = vmax.f32 %v392_v2, %v393_v39  ;;  %v387_v11 = vmax.f32 %v385_v16, %v386_v7  ;;  %1291 = vpow2.f32 %v664_v15  ;;  %v776_v6 = vpop.permute.xlu1 %775 }
  0xe4   :  { %v728_v14 = vsub.f32 %v1691_v53, %v1735_v46  ;;  %1293 = vpow2.f32 %v732_v58  ;;  %v962_v53 = vld [vmem:[%s1987_s0 + $0x4] sm:$0x3] }
  0xe5   :  { %v626_v12 = vsel %vm92_vm1, %v621_v59, %v620_v9  ;;  %v395_v17 = vrot.slane %v394_v10, 2  ;;  %v388_v19 = vrot.slane %v387_v11, 2  ;;  %v1756_v41 = vadd.f32 %v970_v31, %v962_v53 }
  0xe6   :  { %v628_v4 = vadd.f32 %v626_v12, %v623_v51  ;;  %v730_v8 = vmul.f32 1.442695, %v728_v14  ;;  %v771_v51 = vpop.permute.xlu0 %770 }
  0xe7   :  { %v396_v26 = vmax.f32 %v394_v10, %v395_v17  ;;  %v389_v48 = vmax.f32 %v387_v11, %v388_v19 }
  0xe8   :  { %629 = vst [vmem:[#allocation3 + $0x4] sm:$0x3] %v628_v4  ;;  %1295 = vpow2.f32 %v730_v8 }
  0xe9   :  { %v397_v0 = vrot.slane %v396_v26, 1  ;;  %v390_v54 = vrot.slane %v389_v48, 1 }
  0xea   :  { %v1286_v28 = vpop.eup %1285 }
  0xeb   :  { %v1741_v29 = vmax.f32 %v396_v26, %v397_v0  ;;  %v1743_v30 = vmax.f32 %v389_v48, %v390_v54  ;;  %v1288_v33 = vpop.eup %1287  ;;  %v675_v18 = vsel %vm47_vm0, %v1286_v28, 0.0  ;;  %v1224_v28 = vld [vmem:[%s1987_s0 + $0x4] sm:$0x3] }
  0xec   :  { %v1290_v5 = vpop.eup %1289  ;;  %v346_v34 = vsel %vm47_vm0, %v1288_v33, 0.0  ;;  %v676_v13 = vrot.slane %v675_v18, 4 }
  0xed   :  { %v400_v36 = vsub.f32 %v384_v60, %v1741_v29  ;;  %v399_v37 = vsub.f32 %v383_v61, %v1743_v30  ;;  %v1292_v22 = vpop.eup %1291  ;;  %v347_v49 = vrot.slane %v346_v34, 4  ;;  %v339_v40 = vsel %vm47_vm0, %v1290_v5, 0.0 }
  0xee   :  { %v1294_v42 = vpop.eup %1293  ;;  %v340_v20 = vrot.slane %v339_v40, 4  ;;  %v677_v38 = vadd.f32 %v676_v13, %v675_v18  ;;  %v668_v32 = vsel %vm47_vm0, %v1292_v22, 0.0 }
  0xef   :  { %v403_v35 = vmul.f32 1.442695, %v400_v36  ;;  %v763_v59 = vld [vmem:[#allocation3 + $0x4] sm:$0x3]  ;;  %v348_v24 = vadd.f32 %v347_v49, %v346_v34  ;;  %v669_v55 = vrot.slane %v668_v32, 4  ;;  %v741_v25 = vsel %vm47_vm0, %v1294_v42, 0.0 }
  0xf0   :  { %v401_v50 = vmul.f32 1.442695, %v399_v37  ;;  %v341_v60 = vadd.f32 %v340_v20, %v339_v40  ;;  %v678_v61 = vrot.slane %v677_v38, 2  ;;  %v742_v62 = vrot.slane %v741_v25, 4  ;;  %v829_v5 = vld [vmem:[#allocation3 + $0x4] sm:$0x3] }
  0xf1   :  { %1297 = vpow2.f32 %v403_v35  ;;  %v349_v23 = vrot.slane %v348_v24, 2  ;;  %v670_v47 = vadd.f32 %v669_v55, %v668_v32  ;;  %v764_v63 = vadd.f32 %v1221_v21, %v763_v59 }
  0xf2   :  { %v1296_v15 = vpop.eup %1295  ;;  %1299 = vpow2.f32 %v401_v50  ;;  %v342_v45 = vrot.slane %v341_v60, 2  ;;  %v679_v1 = vadd.f32 %v678_v61, %v677_v38  ;;  %v743_v2 = vadd.f32 %v742_v62, %v741_v25 }
  0xf3   :  { %v734_v16 = vsel %vm47_vm0, %v1296_v15, 0.0  ;;  %v350_v39 = vadd.f32 %v349_v23, %v348_v24  ;;  %v671_v7 = vrot.slane %v670_v47, 2  ;;  %v1761_v9 = vadd.f32 %v776_v6, %v764_v63  ;;  %v986_v24 = vld [vmem:[#allocation3 + $0x4] sm:$0x3] }
  0xf4   :  { %v735_v58 = vrot.slane %v734_v16, 4  ;;  %v343_v10 = vadd.f32 %v342_v45, %v341_v60  ;;  %v680_v11 = vrot.slane %v679_v1, 1  ;;  %v744_v14 = vrot.slane %v743_v2, 2  ;;  %v842_v60 = vpop.permute.xlu1 %841 }
  0xf5   :  { %v1763_v12 = vadd.f32 %v771_v51, %v764_v63  ;;  %v351_v17 = vrot.slane %v350_v39, 1  ;;  %v672_v19 = vadd.f32 %v671_v7, %v670_v47  ;;  %v787_v8 = vsel %vm47_vm0, %v1761_v9, -inf  ;;  %v837_v47 = vpop.permute.xlu0 %836 }
  0xf6   :  { %v736_v4 = vadd.f32 %v735_v58, %v734_v16  ;;  %v344_v26 = vrot.slane %v343_v10, 1  ;;  %v681_v48 = vadd.f32 %v680_v11, %v679_v1  ;;  %v745_v0 = vadd.f32 %v744_v14, %v743_v2 }
  0xf7   :  { %v788_v54 = vrot.slane %v787_v8, 4  ;;  %v352_v53 = vadd.f32 %v351_v17, %v350_v39  ;;  %v673_v31 = vrot.slane %v672_v19, 1  ;;  %v780_v18 = vsel %vm47_vm0, %v1763_v12, -inf }
  0xf8   :  { %v737_v33 = vrot.slane %v736_v4, 2  ;;  %v345_v34 = vadd.f32 %v344_v26, %v343_v10  ;;  %1301 = vlog2.f32 %v681_v48  ;;  %v746_v13 = vrot.slane %v745_v0, 1 }
  0xf9   :  { %v789_v36 = vmax.f32 %v787_v8, %v788_v54  ;;  %1303 = vlog2.f32 %v352_v53  ;;  %v674_v37 = vadd.f32 %v673_v31, %v672_v19  ;;  %v781_v49 = vrot.slane %v780_v18, 4 }
  0xfa   :  { %v738_v22 = vadd.f32 %v737_v33, %v736_v4  ;;  %1305 = vlog2.f32 %v345_v34  ;;  %v747_v21 = vadd.f32 %v746_v13, %v745_v0  ;;  %v830_v20 = vadd.f32 %v1224_v28, %v829_v5 }
  0xfb   :  { %v1298_v40 = vpop.eup %1297  ;;  %v790_v42 = vrot.slane %v789_v36, 2  ;;  %1307 = vlog2.f32 %v674_v37  ;;  %v782_v59 = vmax.f32 %v780_v18, %v781_v49  ;;  %v1779_v2 = vadd.f32 %v986_v24, %v1756_v41 }
  0xfc   :  { %v1300_v38 = vpop.eup %1299  ;;  %v412_v32 = vsel %vm47_vm0, %v1298_v40, 0.0  ;;  %v739_v35 = vrot.slane %v738_v22, 1  ;;  %1309 = vlog2.f32 %v747_v21  ;;  %v1774_v23 = vadd.f32 %v842_v60, %v830_v20  ;;  %v359_v60 = vld [vmem:[#allocation2 + $0x2] sm:$0x3] }
  0xfd   :  { %v413_v55 = vrot.slane %v412_v32, 4  ;;  %v405_v50 = vsel %vm47_vm0, %v1300_v38, 0.0  ;;  %v791_v25 = vmax.f32 %v789_v36, %v790_v42  ;;  %v783_v15 = vrot.slane %v782_v59, 2 }
  0xfe   :  { %v406_v61 = vrot.slane %v405_v50, 4  ;;  %v740_v62 = vadd.f32 %v739_v35, %v738_v22  ;;  %v1776_v1 = vadd.f32 %v837_v47, %v830_v20  ;;  %v853_v39 = vsel %vm47_vm0, %v1774_v23, -inf }
  0xff   :  { %v414_v63 = vadd.f32 %v413_v55, %v412_v32  ;;  %v792_v45 = vrot.slane %v791_v25, 1  ;;  %v784_v6 = vmax.f32 %v782_v59, %v783_v15  ;;  %v854_v51 = vrot.slane %v853_v39, 4  ;;  %v689_v55 = vld [vmem:[#allocation3 + $0x6] sm:$0x3] }
 0x100   :  { %v407_v16 = vadd.f32 %v406_v61, %v405_v50  ;;  %1311 = vlog2.f32 %v740_v62  ;;  %v846_v10 = vsel %vm47_vm0, %v1776_v1, -inf  ;;  %v1014_v41 = vsel %vm47_vm0, %v1779_v2, -inf }
 0x101   :  { %v415_v7 = vrot.slane %v414_v63, 2  ;;  %v1783_v58 = vmax.f32 %v791_v25, %v792_v45  ;;  %v785_v14 = vrot.slane %v784_v6, 1  ;;  %v847_v17 = vrot.slane %v846_v10, 4 }
 0x102   :  { %v408_v11 = vrot.slane %v407_v16, 2  ;;  %v1302_v19 = vpop.eup %1301  ;;  %v855_v26 = vmax.f32 %v853_v39, %v854_v51  ;;  %v1015_v48 = vrot.slane %v1014_v41, 4 }
 0x103   :  { %v416_v4 = vadd.f32 %v415_v7, %v414_v63  ;;  %v795_v8 = vsub.f32 %v1761_v9, %v1783_v58  ;;  %v1304_v0 = vpop.eup %1303  ;;  %v685_v54 = vmul.f32 0.6931472, %v1302_v19  ;;  %v1791_v53 = vmax.f32 %v784_v6, %v785_v14  ;;  %v755_v6 = vld [vmem:[#allocation3 + $0x8] sm:$0x3] }
 0x104   :  { %v409_v28 = vadd.f32 %v408_v11, %v407_v16  ;;  %v848_v31 = vmax.f32 %v846_v10, %v847_v17  ;;  %v1306_v33 = vpop.eup %1305  ;;  %v356_v18 = vmul.f32 0.6931472, %v1304_v0  ;;  %v856_v13 = vrot.slane %v855_v26, 2  ;;  %v964_v17 = vld [vmem:[%s1987_s0 + $0x8] sm:$0x3] }
 0x105   :  { %v417_v5 = vrot.slane %v416_v4, 1  ;;  %v798_v34 = vmul.f32 1.442695, %v795_v8  ;;  %v1308_v36 = vpop.eup %1307  ;;  %v354_v37 = vmul.f32 0.6931472, %v1306_v33  ;;  %v687_v22 = vadd.f32 %v685_v54, %v1710_v43 }
 0x106   :  { %v410_v49 = vrot.slane %v409_v28, 1  ;;  %v794_v9 = vsub.f32 %v1763_v12, %v1791_v53  ;;  %v1310_v40 = vpop.eup %1309  ;;  %v358_v21 = vadd.f32 %v356_v18, %v1714_v52  ;;  %v683_v42 = vmul.f32 0.6931472, %v1308_v36  ;;  %v971_v8 = vld [vmem:[#allocation2 + $0x6] sm:$0x3] }
 0x107   :  { %v418_v20 = vadd.f32 %v417_v5, %v416_v4  ;;  %1313 = vpow2.f32 %v798_v34  ;;  %v357_v38 = vadd.f32 %v354_v37, %v1716_v57  ;;  %v751_v35 = vmul.f32 0.6931472, %v1310_v40  ;;  %v963_v4 = vld [vmem:[%s1987_s0 + $0x6] sm:$0x3]  ;;  %v961_v18 = vld [vmem:[%s1987_s0 + $0x2] sm:$0x3] }
 0x108   :  { %v411_v32 = vadd.f32 %v410_v49, %v409_v28  ;;  %v796_v59 = vmul.f32 1.442695, %v794_v9  ;;  %v686_v24 = vadd.f32 %v683_v42, %v1712_v44  ;;  %v857_v43 = vmax.f32 %v855_v26, %v856_v13  ;;  %v1208_v26 = vld [vmem:[%s1987_s0 + $0x2] sm:$0x3]  ;;  %v1227_v33 = vld [vmem:[%s1987_s0 + $0x6] sm:$0x3] }
 0x109   :  { %1315 = vlog2.f32 %v418_v20  ;;  %v849_v50 = vrot.slane %v848_v31, 2  ;;  %v362_v12 = vsel %vm92_vm1, %v358_v21, %v357_v38  ;;  %v753_v52 = vadd.f32 %v751_v35, %v1723_v56 }
 0x10a   :  { %v1312_v25 = vpop.eup %1311  ;;  %1317 = vlog2.f32 %v411_v32  ;;  %v1016_v61 = vmax.f32 %v1014_v41, %v1015_v48  ;;  %v364_v62 = vadd.f32 %v362_v12, %v359_v60  ;;  %v692_v57 = vsel %vm92_vm1, %v687_v22, %v686_v24  ;;  %v972_v41 = vld [vmem:[#allocation2 + $0x8] sm:$0x3]  ;;  %v425_v24 = vld [vmem:[#allocation2] sm:$0x3]  ;;  %v903_v60 = vpop.permute.xlu0 %902 }
 0x10b   :  { %v749_v15 = vmul.f32 0.6931472, %v1312_v25  ;;  %1319 = vpow2.f32 %v796_v59  ;;  %v694_v47 = vadd.f32 %v692_v57, %v689_v55  ;;  %v858_v63 = vrot.slane %v857_v43, 1  ;;  %v908_v25 = vpop.permute.xlu1 %907 }
 0x10c   :  { %v850_v44 = vmax.f32 %v848_v31, %v849_v50  ;;  %v1017_v45 = vrot.slane %v1016_v61, 2  ;;  %365 = vst [vmem:[#allocation2 + $0x2] sm:$0x3] %v364_v62  ;;  %v980_v5 = vadd.f32 %v972_v41, %v964_v17  ;;  %v979_v22 = vadd.f32 %v971_v8, %v963_v4 }
 0x10d   :  { %v752_v16 = vadd.f32 %v749_v15, %v1735_v46  ;;  %695 = vst [vmem:[#allocation3 + $0x6] sm:$0x3] %v694_v47  ;;  %v1803_v39 = vmax.f32 %v857_v43, %v858_v63 }
 0x10e   :  { %v851_v7 = vrot.slane %v850_v44, 1  ;;  %v1018_v51 = vmax.f32 %v1016_v61, %v1017_v45 }
 0x10f   :  { %v758_v56 = vsel %vm92_vm1, %v753_v52, %v752_v16  ;;  %v861_v11 = vsub.f32 %v1774_v23, %v1803_v39 }
 0x110   :  { %v760_v10 = vadd.f32 %v758_v56, %v755_v6  ;;  %v1808_v14 = vmax.f32 %v850_v44, %v851_v7  ;;  %v1019_v46 = vrot.slane %v1018_v51, 1 }
 0x111   :  { %v1314_v19 = vpop.eup %1313  ;;  %v864_v48 = vmul.f32 1.442695, %v861_v11 }
 0x112   :  { %761 = vst [vmem:[#allocation3 + $0x8] sm:$0x3] %v760_v10  ;;  %v807_v23 = vsel %vm47_vm0, %v1314_v19, 0.0  ;;  %v860_v0 = vsub.f32 %v1776_v1, %v1808_v14  ;;  %v1822_v54 = vmax.f32 %v1018_v51, %v1019_v46 }
 0x113   :  { %v1316_v28 = vpop.eup %1315  ;;  %v808_v31 = vrot.slane %v807_v23, 4  ;;  %v434_v36 = vld [vmem:[#allocation2 + $0x2] sm:$0x3]  ;;  %1321 = vpow2.f32 %v864_v48 }
 0x114   :  { %v1318_v34 = vpop.eup %1317  ;;  %v422_v13 = vmul.f32 0.6931472, %v1316_v28  ;;  %v862_v37 = vmul.f32 1.442695, %v860_v0  ;;  %v435_v9 = vadd.f32 %v1208_v26, %v434_v36  ;;  %v895_v21 = vld [vmem:[#allocation3 + $0x6] sm:$0x3]  ;;  %v1058_v20 = vsub.f32 %v1779_v2, %v1822_v54 }
 0x115   :  { %v1320_v1 = vpop.eup %1319  ;;  %v420_v49 = vmul.f32 0.6931472, %v1318_v34  ;;  %v809_v40 = vadd.f32 %v808_v31, %v807_v23  ;;  %v969_v42 = vld [vmem:[#allocation2 + $0x2] sm:$0x3]  ;;  %v896_v35 = vadd.f32 %v1227_v33, %v895_v21  ;;  %v987_v45 = vld [vmem:[#allocation3 + $0x6] sm:$0x3] }
 0x116   :  { %v424_v38 = vadd.f32 %v422_v13, %v1741_v29  ;;  %v800_v32 = vsel %vm47_vm0, %v1320_v1, 0.0  ;;  %1323 = vpow2.f32 %v862_v37  ;;  %v1836_v55 = vadd.f32 %v1659_v3, %v435_v9 }
 0x117   :  { %v423_v59 = vadd.f32 %v420_v49, %v1743_v30  ;;  %v1839_v43 = vadd.f32 %v1661_v27, %v435_v9  ;;  %v810_v50 = vrot.slane %v809_v40, 2  ;;  %v801_v12 = vrot.slane %v800_v32, 4  ;;  %v985_v27 = vld [vmem:[#allocation3 + $0x2] sm:$0x3] }
 0x118   :  { %v1841_v52 = vadd.f32 %v908_v25, %v896_v35  ;;  %v1843_v29 = vadd.f32 %v903_v60, %v896_v35  ;;  %v977_v61 = vadd.f32 %v969_v42, %v961_v18  ;;  %v458_v30 = vsel %vm47_vm0, %v1836_v55, -inf }
 0x119   :  { %v428_v62 = vsel %vm92_vm1, %v424_v38, %v423_v59  ;;  %v451_v3 = vsel %vm47_vm0, %v1839_v43, -inf  ;;  %v811_v57 = vadd.f32 %v810_v50, %v809_v40  ;;  %v459_v47 = vrot.slane %v458_v30, 4  ;;  %v988_v16 = vld [vmem:[#allocation3 + $0x8] sm:$0x3] }
 0x11a   :  { %v430_v15 = vadd.f32 %v428_v62, %v425_v24  ;;  %v452_v63 = vrot.slane %v451_v3, 4  ;;  %v802_v44 = vadd.f32 %v801_v12, %v800_v32  ;;  %v919_v7 = vsel %vm47_vm0, %v1841_v52, -inf }
 0x11b   :  { %v812_v6 = vrot.slane %v811_v57, 1  ;;  %v912_v51 = vsel %vm47_vm0, %v1843_v29, -inf  ;;  %v1854_v56 = vadd.f32 %v985_v27, %v977_v61  ;;  %v460_v10 = vmax.f32 %v458_v30, %v459_v47 }
 0x11c   :  { %431 = vst [vmem:[#allocation2] sm:$0x3] %v430_v15  ;;  %v453_v11 = vmax.f32 %v451_v3, %v452_v63  ;;  %v803_v17 = vrot.slane %v802_v44, 2  ;;  %v920_v41 = vrot.slane %v919_v7, 4  ;;  %v913_v19 = vrot.slane %v912_v51, 4 }
 0x11d   :  { %v813_v46 = vadd.f32 %v812_v6, %v811_v57  ;;  %v1856_v4 = vadd.f32 %v987_v45, %v979_v22  ;;  %v1858_v8 = vadd.f32 %v988_v16, %v980_v5  ;;  %v1322_v26 = vpop.eup %1321  ;;  %v461_v23 = vrot.slane %v460_v10, 2 }
 0x11e   :  { %v454_v48 = vrot.slane %v453_v11, 2  ;;  %v804_v0 = vadd.f32 %v803_v17, %v802_v44  ;;  %v921_v28 = vmax.f32 %v919_v7, %v920_v41  ;;  %v873_v31 = vsel %vm47_vm0, %v1322_v26, 0.0 }
 0x11f   :  { %1325 = vlog2.f32 %v813_v46  ;;  %v914_v33 = vmax.f32 %v912_v51, %v913_v19  ;;  %v1007_v18 = vsel %vm47_vm0, %v1854_v56, -inf  ;;  %v462_v13 = vmax.f32 %v460_v10, %v461_v23 }
 0x120   :  { %v1324_v34 = vpop.eup %1323  ;;  %v455_v36 = vmax.f32 %v453_v11, %v454_v48  ;;  %v805_v37 = vrot.slane %v804_v0, 1  ;;  %v874_v22 = vrot.slane %v873_v31, 4  ;;  %v922_v1 = vrot.slane %v921_v28, 2 }
 0x121   :  { %v866_v5 = vsel %vm47_vm0, %v1324_v34, 0.0  ;;  %v915_v49 = vrot.slane %v914_v33, 2  ;;  %v1008_v9 = vrot.slane %v1007_v18, 4  ;;  %v463_v40 = vrot.slane %v462_v13, 1 }
 0x122   :  { %v456_v21 = vrot.slane %v455_v36, 1  ;;  %v806_v42 = vadd.f32 %v805_v37, %v804_v0  ;;  %v875_v38 = vadd.f32 %v874_v22, %v873_v31  ;;  %v867_v32 = vrot.slane %v866_v5, 4 }
 0x123   :  { %v923_v35 = vmax.f32 %v921_v28, %v922_v1  ;;  %v916_v59 = vmax.f32 %v914_v33, %v915_v49  ;;  %v1009_v24 = vmax.f32 %v1007_v18, %v1008_v9  ;;  %v1864_v50 = vmax.f32 %v462_v13, %v463_v40  ;;  %v821_v9 = vld [vmem:[#allocation3 + $0xa] sm:$0x3] }
 0x124   :  { %v1866_v25 = vmax.f32 %v455_v36, %v456_v21  ;;  %1327 = vlog2.f32 %v806_v42  ;;  %v876_v60 = vrot.slane %v875_v38, 2  ;;  %v868_v12 = vadd.f32 %v867_v32, %v866_v5  ;;  %v973_v32 = vld [vmem:[#allocation2 + $0xa] sm:$0x3] }
 0x125   :  { %v924_v61 = vrot.slane %v923_v35, 1  ;;  %v917_v62 = vrot.slane %v916_v59, 1  ;;  %v1010_v30 = vrot.slane %v1009_v24, 2  ;;  %v466_v3 = vsub.f32 %v1836_v55, %v1864_v50 }
 0x126   :  { %v465_v57 = vsub.f32 %v1839_v43, %v1866_v25  ;;  %v877_v27 = vadd.f32 %v876_v60, %v875_v38  ;;  %v1021_v15 = vsel %vm47_vm0, %v1856_v4, -inf  ;;  %v869_v47 = vrot.slane %v868_v12, 2 }
 0x127   :  { %v1874_v63 = vmax.f32 %v923_v35, %v924_v61  ;;  %v1876_v44 = vmax.f32 %v916_v59, %v917_v62  ;;  %v1011_v45 = vmax.f32 %v1009_v24, %v1010_v30  ;;  %v469_v16 = vmul.f32 1.442695, %v466_v3 }
 0x128   :  { %v467_v6 = vmul.f32 1.442695, %v465_v57  ;;  %v878_v7 = vrot.slane %v877_v27, 1  ;;  %v1022_v51 = vrot.slane %v1021_v15, 4  ;;  %v870_v11 = vadd.f32 %v869_v47, %v868_v12 }
 0x129   :  { %v1326_v10 = vpop.eup %1325  ;;  %v927_v55 = vsub.f32 %v1841_v52, %v1874_v63  ;;  %v926_v43 = vsub.f32 %v1843_v29, %v1876_v44  ;;  %v1012_v17 = vrot.slane %v1011_v45, 1  ;;  %1329 = vpow2.f32 %v469_v16 }
 0x12a   :  { %v817_v41 = vmul.f32 0.6931472, %v1326_v10  ;;  %v879_v46 = vadd.f32 %v878_v7, %v877_v27  ;;  %v1023_v19 = vmax.f32 %v1021_v15, %v1022_v51  ;;  %1331 = vpow2.f32 %v467_v6 }
 0x12b   :  { %v871_v26 = vrot.slane %v870_v11, 1  ;;  %v930_v23 = vmul.f32 1.442695, %v927_v55  ;;  %v928_v48 = vmul.f32 1.442695, %v926_v43  ;;  %v1882_v0 = vmax.f32 %v1011_v45, %v1012_v17 }
 0x12c   :  { %1333 = vlog2.f32 %v879_v46  ;;  %v1024_v28 = vrot.slane %v1023_v19, 2  ;;  %v1028_v52 = vsel %vm47_vm0, %v1858_v8, -inf  ;;  %v1068_v29 = vmul.f32 1.442695, %v1058_v20 }
 0x12d   :  { %v872_v31 = vadd.f32 %v871_v26, %v870_v11  ;;  %1335 = vpow2.f32 %v930_v23  ;;  %v1029_v34 = vrot.slane %v1028_v52, 4  ;;  %v1057_v13 = vsub.f32 %v1854_v56, %v1882_v0 }
 0x12e   :  { %v1328_v33 = vpop.eup %1327  ;;  %1337 = vpow2.f32 %v928_v48  ;;  %v1025_v18 = vmax.f32 %v1023_v19, %v1024_v28  ;;  %v819_v36 = vadd.f32 %v817_v41, %v1783_v58  ;;  %v965_v58 = vld [vmem:[%s1987_s0 + $0xa] sm:$0x3] }
 0x12f   :  { %v815_v37 = vmul.f32 0.6931472, %v1328_v33  ;;  %1339 = vlog2.f32 %v872_v31  ;;  %v1030_v5 = vmax.f32 %v1028_v52, %v1029_v34  ;;  %v1066_v1 = vmul.f32 1.442695, %v1057_v13 }
 0x130   :  { %v1026_v22 = vrot.slane %v1025_v18, 1  ;;  %1341 = vpow2.f32 %v1068_v29  ;;  %v981_v15 = vadd.f32 %v973_v32, %v965_v58  ;;  %v887_v29 = vld [vmem:[#allocation3 + $0xc] sm:$0x3] }
 0x131   :  { %v818_v49 = vadd.f32 %v815_v37, %v1791_v53  ;;  %v1031_v20 = vrot.slane %v1030_v5, 2  ;;  %1343 = vpow2.f32 %v1066_v1 }
 0x132   :  { %v1893_v40 = vmax.f32 %v1025_v18, %v1026_v22 }
 0x133   :  { %v824_v21 = vsel %vm92_vm1, %v819_v36, %v818_v49  ;;  %v1330_v42 = vpop.eup %1329  ;;  %v1032_v35 = vmax.f32 %v1030_v5, %v1031_v20 }
 0x134   :  { %v826_v38 = vadd.f32 %v824_v21, %v821_v9  ;;  %v1059_v59 = vsub.f32 %v1856_v4, %v1893_v40  ;;  %v1332_v24 = vpop.eup %1331  ;;  %v478_v53 = vsel %vm47_vm0, %v1330_v42, 0.0 }
 0x135   :  { %v479_v12 = vrot.slane %v478_v53, 4  ;;  %v471_v61 = vsel %vm47_vm0, %v1332_v24, 0.0  ;;  %v1033_v62 = vrot.slane %v1032_v35, 1  ;;  %v974_v24 = vld [vmem:[#allocation2 + $0xc] sm:$0x3] }
 0x136   :  { %v1334_v60 = vpop.eup %1333  ;;  %827 = vst [vmem:[#allocation3 + $0xa] sm:$0x3] %v826_v38  ;;  %v1070_v30 = vmul.f32 1.442695, %v1059_v59  ;;  %v472_v57 = vrot.slane %v471_v61, 4 }
 0x137   :  { %v1336_v3 = vpop.eup %1335  ;;  %v883_v27 = vmul.f32 0.6931472, %v1334_v60  ;;  %v480_v45 = vadd.f32 %v479_v12, %v478_v53  ;;  %v1904_v6 = vmax.f32 %v1032_v35, %v1033_v62  ;;  %v966_v59 = vld [vmem:[%s1987_s0 + $0xc] sm:$0x3] }
 0x138   :  { %v1338_v47 = vpop.eup %1337  ;;  %v939_v16 = vsel %vm47_vm0, %v1336_v3, 0.0  ;;  %1345 = vpow2.f32 %v1070_v30  ;;  %v473_v51 = vadd.f32 %v472_v57, %v471_v61 }
 0x139   :  { %v1340_v7 = vpop.eup %1339  ;;  %v885_v10 = vadd.f32 %v883_v27, %v1803_v39  ;;  %v940_v11 = vrot.slane %v939_v16, 4  ;;  %v932_v55 = vsel %vm47_vm0, %v1338_v47, 0.0  ;;  %v481_v17 = vrot.slane %v480_v45, 2 }
 0x13a   :  { %v1342_v43 = vpop.eup %1341  ;;  %v881_v41 = vmul.f32 0.6931472, %v1340_v7  ;;  %v933_v46 = vrot.slane %v932_v55, 4  ;;  %v1060_v19 = vsub.f32 %v1858_v8, %v1904_v6  ;;  %v474_v26 = vrot.slane %v473_v51, 2 }
 0x13b   :  { %v941_v23 = vadd.f32 %v940_v11, %v939_v16  ;;  %v1094_v48 = vsel %vm47_vm0, %v1342_v43, 0.0  ;;  %v1344_v28 = vpop.eup %1343  ;;  %v482_v31 = vadd.f32 %v481_v17, %v480_v45 }
 0x13c   :  { %v884_v52 = vadd.f32 %v881_v41, %v1808_v14  ;;  %v934_v39 = vadd.f32 %v933_v46, %v932_v55  ;;  %v1072_v33 = vmul.f32 1.442695, %v1060_v19  ;;  %v475_v18 = vadd.f32 %v474_v26, %v473_v51 }
 0x13d   :  { %v942_v34 = vrot.slane %v941_v23, 2  ;;  %v989_v13 = vld [vmem:[#allocation3 + $0xa] sm:$0x3]  ;;  %v1087_v36 = vsel %vm47_vm0, %v1344_v28, 0.0  ;;  %v1095_v37 = vrot.slane %v1094_v48, 4  ;;  %v483_v22 = vrot.slane %v482_v31, 1 }
 0x13e   :  { %v890_v5 = vsel %vm92_vm1, %v885_v10, %v884_v52  ;;  %v935_v1 = vrot.slane %v934_v39, 2  ;;  %v1914_v49 = vadd.f32 %v989_v13, %v981_v15  ;;  %v476_v9 = vrot.slane %v475_v18, 1 }
 0x13f   :  { %v892_v20 = vadd.f32 %v890_v5, %v887_v29  ;;  %v943_v21 = vadd.f32 %v942_v34, %v941_v23  ;;  %1347 = vpow2.f32 %v1072_v33  ;;  %v484_v14 = vadd.f32 %v483_v22, %v482_v31 }
 0x140   :  { %v936_v42 = vadd.f32 %v935_v1, %v934_v39  ;;  %v1035_v38 = vsel %vm47_vm0, %v1914_v49, -inf  ;;  %v1088_v58 = vrot.slane %v1087_v36, 4  ;;  %v477_v32 = vadd.f32 %v476_v9, %v475_v18 }
 0x141   :  { %893 = vst [vmem:[#allocation3 + $0xc] sm:$0x3] %v892_v20  ;;  %v944_v35 = vrot.slane %v943_v21, 1  ;;  %v1036_v53 = vrot.slane %v1035_v38, 4  ;;  %v1096_v60 = vadd.f32 %v1095_v37, %v1094_v48  ;;  %1349 = vlog2.f32 %v484_v14 }
 0x142   :  { %v1346_v12 = vpop.eup %1345  ;;  %v937_v61 = vrot.slane %v936_v42, 1  ;;  %v1089_v62 = vadd.f32 %v1088_v58, %v1087_v36  ;;  %1351 = vlog2.f32 %v477_v32  ;;  %v982_v15 = vadd.f32 %v974_v24, %v966_v59 }
 0x143   :  { %v945_v30 = vadd.f32 %v944_v35, %v943_v21  ;;  %v1037_v3 = vmax.f32 %v1035_v38, %v1036_v53  ;;  %v1097_v57 = vrot.slane %v1096_v60, 2  ;;  %v1101_v45 = vsel %vm47_vm0, %v1346_v12, 0.0 }
 0x144   :  { %v938_v27 = vadd.f32 %v937_v61, %v936_v42  ;;  %v1090_v47 = vrot.slane %v1089_v62, 2  ;;  %v1102_v51 = vrot.slane %v1101_v45, 4 }
 0x145   :  { %1353 = vlog2.f32 %v945_v30  ;;  %v1038_v16 = vrot.slane %v1037_v3, 2  ;;  %v1098_v7 = vadd.f32 %v1097_v57, %v1096_v60  ;;  %v491_v60 = vld [vmem:[#allocation2] sm:$0x3] }
 0x146   :  { %1355 = vlog2.f32 %v938_v27  ;;  %v1091_v10 = vadd.f32 %v1090_v47, %v1089_v62  ;;  %v1103_v43 = vadd.f32 %v1102_v51, %v1101_v45 }
 0x147   :  { %v1039_v11 = vmax.f32 %v1037_v3, %v1038_v16  ;;  %v1099_v55 = vrot.slane %v1098_v7, 1  ;;  %v953_v3 = vld [vmem:[#allocation3 + $0xe] sm:$0x3] }
 0x148   :  { %v990_v17 = vld [vmem:[#allocation3 + $0xc] sm:$0x3]  ;;  %v1092_v41 = vrot.slane %v1091_v10, 1  ;;  %v1104_v23 = vrot.slane %v1103_v43, 2 }
 0x149   :  { %v1348_v46 = vpop.eup %1347  ;;  %v1922_v19 = vadd.f32 %v990_v17, %v982_v15  ;;  %v1040_v26 = vrot.slane %v1039_v11, 1  ;;  %v1100_v28 = vadd.f32 %v1099_v55, %v1098_v7 }
 0x14a   :  { %v1093_v48 = vadd.f32 %v1092_v41, %v1091_v10  ;;  %v1108_v31 = vsel %vm47_vm0, %v1348_v46, 0.0  ;;  %v1105_v39 = vadd.f32 %v1104_v23, %v1103_v43  ;;  %v975_v10 = vld [vmem:[#allocation2 + $0xe] sm:$0x3]  ;;  %v960_v43 = vld [vmem:[%s1987_s0] sm:$0x3] }
 0x14b   :  { %v1925_v52 = vmax.f32 %v1039_v11, %v1040_v26  ;;  %v1042_v29 = vsel %vm47_vm0, %v1922_v19, -inf  ;;  %v1109_v33 = vrot.slane %v1108_v31, 4  ;;  %v1350_v18 = vpop.eup %1349 }
 0x14c   :  { %v1043_v34 = vrot.slane %v1042_v29, 4  ;;  %1357 = vlog2.f32 %v1093_v48  ;;  %v1352_v13 = vpop.eup %1351  ;;  %v488_v36 = vmul.f32 0.6931472, %v1350_v18  ;;  %v1106_v22 = vrot.slane %v1105_v39, 1 }
 0x14d   :  { %v1061_v37 = vsub.f32 %v1914_v49, %v1925_v52  ;;  %v1110_v5 = vadd.f32 %v1109_v33, %v1108_v31  ;;  %v486_v1 = vmul.f32 0.6931472, %v1352_v13  ;;  %1359 = vlog2.f32 %v1100_v28  ;;  %v984_v31 = vld [vmem:[#allocation3] sm:$0x3] }
 0x14e   :  { %v1044_v9 = vmax.f32 %v1042_v29, %v1043_v34  ;;  %v490_v21 = vadd.f32 %v488_v36, %v1864_v50  ;;  %v1107_v42 = vadd.f32 %v1106_v22, %v1105_v39 }
 0x14f   :  { %v1354_v20 = vpop.eup %1353  ;;  %v1074_v14 = vmul.f32 1.442695, %v1061_v37  ;;  %v1111_v38 = vrot.slane %v1110_v5, 2  ;;  %v489_v32 = vadd.f32 %v486_v1, %v1866_v25 }
 0x150   :  { %v1356_v58 = vpop.eup %1355  ;;  %v949_v35 = vmul.f32 0.6931472, %v1354_v20  ;;  %v1045_v59 = vrot.slane %v1044_v9, 2 }
 0x151   :  { %v947_v24 = vmul.f32 0.6931472, %v1356_v58  ;;  %1361 = vpow2.f32 %v1074_v14  ;;  %v1112_v53 = vadd.f32 %v1111_v38, %v1110_v5  ;;  %v494_v12 = vsel %vm92_vm1, %v490_v21, %v489_v32 }
 0x152   :  { %v951_v61 = vadd.f32 %v949_v35, %v1874_v63  ;;  %v1046_v62 = vmax.f32 %v1044_v9, %v1045_v59  ;;  %1363 = vlog2.f32 %v1107_v42  ;;  %v496_v30 = vadd.f32 %v494_v12, %v491_v60 }
 0x153   :  { %v950_v50 = vadd.f32 %v947_v24, %v1876_v44  ;;  %v1113_v57 = vrot.slane %v1112_v53, 1  ;;  %v967_v44 = vld [vmem:[%s1987_s0 + $0xe] sm:$0x3]  ;;  %s1407_s0 = smov [#allocation4]  }
 0x154   :  { %v1047_v27 = vrot.slane %v1046_v62, 1  ;;  %497 = vst [vmem:[#allocation2] sm:$0x3] %v496_v30  ;;  %v983_v28 = vadd.f32 %v975_v10, %v967_v44  ;;  %s1181_s23 = sshll.u32 %s1407_s0, 4  ;;  %s1182_s23 = int_to_ptr.vmem [resolvable:$true] %s1181_s23 }
 0x155   :  { %v956_v25 = vsel %vm92_vm1, %v951_v61, %v950_v50  ;;  %v1114_v15 = vadd.f32 %v1113_v57, %v1112_v53  ;;  %s1381_s24 = scalar_lea.vmem %s1182_s23, 256  ;;  %p1386_p1 = scmp.lt.s32.totalorder %s1182_s23, %s1182_s23 }
 0x156   :  { %v1358_v47 = vpop.eup %1357  ;;  %v958_v45 = vadd.f32 %v956_v25, %v953_v3  ;;  %v1937_v16 = vmax.f32 %v1046_v62, %v1047_v27  ;;  %p1382_p0 = scmp.ne.s32.totalorder %s1182_s23, %s1381_s24  ;;  %p1387_p2 = scmp.lt.s32.totalorder %s1381_s24, %s1381_s24 }
 0x157   :  { %v1139_v7 = vmul.f32 0.6931472, %v1358_v47  ;;  %1365 = vlog2.f32 %v1114_v15  ;;  %v1360_v51 = vpop.eup %1359 }
 0x158   :  { %959 = vst [vmem:[#allocation3 + $0xe] sm:$0x3] %v958_v45  ;;  %v1062_v63 = vsub.f32 %v1922_v19, %v1937_v16  ;;  %v1141_v11 = vmul.f32 0.6931472, %v1360_v51  ;;  %p1388_p3 = por %p1387_p2, %p1386_p1 }
 0x159   :  { %v1153_v55 = vadd.f32 %v1139_v7, %v1882_v0 }
 0x15a   :  { %v1076_v17 = vmul.f32 1.442695, %v1062_v63  ;;  %v1154_v46 = vadd.f32 %v1141_v11, %v1822_v54  ;;  %p1389_p4 = pnand %p1388_p3, %p1382_p0 }
 0x15b   :  { %v1362_v41 = vpop.eup %1361  ;;  %v1161_v26 = vsub.f32 %v1854_v56, %v1153_v55  ;;  %v968_v48 = vld [vmem:[#allocation2] sm:$0x3] }
 0x15c   :  { %v1364_v23 = vpop.eup %1363  ;;  %1367 = vpow2.f32 %v1076_v17  ;;  %v1115_v29 = vsel %vm47_vm0, %v1362_v41, 0.0  ;;  %v976_v39 = vadd.f32 %v968_v48, %v960_v43  ;;  %v1162_v18 = vsub.f32 %v1779_v2, %v1154_v46 }
 0x15d   :  { %v1116_v33 = vrot.slane %v1115_v29, 4  ;;  %v1143_v0 = vmul.f32 0.6931472, %v1364_v23  ;;  %1169 = vst [vmem:[#allocation4 + $0x2] sm:$0x3] %v1161_v26 }
 0x15e   :  { %v1952_v13 = vadd.f32 %v984_v31, %v976_v39  ;;  %1170 = vst [vmem:[#allocation4 + $0x4] sm:$0x3] %v1162_v18 }
 0x15f   :  { %v991_v34 = vld [vmem:[#allocation3 + $0xe] sm:$0x3]  ;;  %v1117_v36 = vadd.f32 %v1116_v33, %v1115_v29  ;;  %v1155_v54 = vadd.f32 %v1143_v0, %v1893_v40 }
 0x160   :  { %v1955_v56 = vadd.f32 %v991_v34, %v983_v28  ;;  %v1000_v22 = vsel %vm47_vm0, %v1952_v13, -inf }
 0x161   :  { %v1366_v37 = vpop.eup %1365  ;;  %v1118_v5 = vrot.slane %v1117_v36, 2  ;;  %v1163_v1 = vsub.f32 %v1856_v4, %v1155_v54  ;;  %v1001_v9 = vrot.slane %v1000_v22, 4 }
 0x162   :  { %v1049_v2 = vsel %vm47_vm0, %v1955_v56, -inf  ;;  %v1145_v20 = vmul.f32 0.6931472, %v1366_v37 }
 0x163   :  { %v1050_v21 = vrot.slane %v1049_v2, 4  ;;  %v1119_v14 = vadd.f32 %v1118_v5, %v1117_v36  ;;  %1171 = vst [vmem:[#allocation4 + $0x6] sm:$0x3] %v1163_v1  ;;  %v1002_v42 = vmax.f32 %v1000_v22, %v1001_v9 }
 0x164   :  { %v1156_v40 = vadd.f32 %v1145_v20, %v1904_v6 }
 0x165   :  { %v1051_v38 = vmax.f32 %v1049_v2, %v1050_v21  ;;  %v1120_v58 = vrot.slane %v1119_v14, 1  ;;  %v1003_v35 = vrot.slane %v1002_v42, 2 }
 0x166   :  { %v1368_v32 = vpop.eup %1367  ;;  %v1164_v59 = vsub.f32 %v1858_v8, %v1156_v40 }
 0x167   :  { %v1052_v24 = vrot.slane %v1051_v38, 2  ;;  %v1121_v53 = vadd.f32 %v1120_v58, %v1119_v14  ;;  %v1122_v4 = vsel %vm47_vm0, %v1368_v32, 0.0  ;;  %v1004_v60 = vmax.f32 %v1002_v42, %v1003_v35 }
 0x168   :  { %v1123_v12 = vrot.slane %v1122_v4, 4  ;;  %1172 = vst [vmem:[#allocation4 + $0x8] sm:$0x3] %v1164_v59 }
 0x169   :  { %v1053_v61 = vmax.f32 %v1051_v38, %v1052_v24  ;;  %1369 = vlog2.f32 %v1121_v53  ;;  %v1005_v62 = vrot.slane %v1004_v60, 1 }
 0x16a   :  { %v1124_v30 = vadd.f32 %v1123_v12, %v1122_v4 }
 0x16b   :  { %v1054_v50 = vrot.slane %v1053_v61, 1  ;;  %v1006_v3 = vmax.f32 %v1004_v60, %v1005_v62 }
 0x16c   :  { %v1125_v6 = vrot.slane %v1124_v30, 2 }
 0x16d   :  { %v1055_v57 = vmax.f32 %v1053_v61, %v1054_v50  ;;  %v1056_v27 = vsub.f32 %v1952_v13, %v1006_v3 }
 0x16e   :  { %v1126_v25 = vadd.f32 %v1125_v6, %v1124_v30 }
 0x16f   :  { %v1063_v8 = vsub.f32 %v1955_v56, %v1055_v57  ;;  %v1064_v15 = vmul.f32 1.442695, %v1056_v27 }
 0x170   :  { %v1127_v47 = vrot.slane %v1126_v25, 1 }
 0x171   :  { %v1078_v45 = vmul.f32 1.442695, %v1063_v8  ;;  %1371 = vpow2.f32 %v1064_v15 }
 0x172   :  { %v1128_v7 = vadd.f32 %v1127_v47, %v1126_v25 }
 0x173   :  { %v1370_v51 = vpop.eup %1369  ;;  %1373 = vpow2.f32 %v1078_v45 }
 0x174   :  { %v1147_v63 = vmul.f32 0.6931472, %v1370_v51  ;;  %1375 = vlog2.f32 %v1128_v7 }
 0x176   :  { %v1157_v44 = vadd.f32 %v1147_v63, %v1925_v52 }
 0x178   :  { %v1165_v10 = vsub.f32 %v1914_v49, %v1157_v44 }
 0x17a   :  { %1173 = vst [vmem:[#allocation4 + $0xa] sm:$0x3] %v1165_v10 }
 0x17b   :  { %v1372_v11 = vpop.eup %1371 }
 0x17c   :  { %v1080_v43 = vsel %vm47_vm0, %v1372_v11, 0.0 }
 0x17d   :  { %v1374_v55 = vpop.eup %1373  ;;  %v1081_v41 = vrot.slane %v1080_v43, 4 }
 0x17e   :  { %v1376_v17 = vpop.eup %1375  ;;  %v1129_v46 = vsel %vm47_vm0, %v1374_v55, 0.0 }
 0x17f   :  { %v1130_v26 = vrot.slane %v1129_v46, 4  ;;  %v1149_v23 = vmul.f32 0.6931472, %v1376_v17  ;;  %v1082_v48 = vadd.f32 %v1081_v41, %v1080_v43 }
 0x181   :  { %v1131_v28 = vadd.f32 %v1130_v26, %v1129_v46  ;;  %v1158_v31 = vadd.f32 %v1149_v23, %v1937_v16  ;;  %v1083_v29 = vrot.slane %v1082_v48, 2 }
 0x183   :  { %v1132_v39 = vrot.slane %v1131_v28, 2  ;;  %v1166_v52 = vsub.f32 %v1922_v19, %v1158_v31  ;;  %v1084_v49 = vadd.f32 %v1083_v29, %v1082_v48 }
 0x185   :  { %v1133_v33 = vadd.f32 %v1132_v39, %v1131_v28  ;;  %1174 = vst [vmem:[#allocation4 + $0xc] sm:$0x3] %v1166_v52  ;;  %v1085_v0 = vrot.slane %v1084_v49, 1 }
 0x187   :  { %v1134_v18 = vrot.slane %v1133_v33, 1  ;;  %v1086_v34 = vadd.f32 %v1085_v0, %v1084_v49 }
 0x189   :  { %v1135_v36 = vadd.f32 %v1134_v18, %v1133_v33  ;;  %1377 = vlog2.f32 %v1086_v34 }
 0x18b   :  { %1379 = vlog2.f32 %v1135_v36 }
 0x193   :  { %v1378_v54 = vpop.eup %1377 }
 0x194   :  { %v1137_v22 = vmul.f32 0.6931472, %v1378_v54 }
 0x195   :  { %v1380_v37 = vpop.eup %1379 }
 0x196   :  { %v1151_v5 = vmul.f32 0.6931472, %v1380_v37  ;;  %v1152_v1 = vadd.f32 %v1137_v22, %v1006_v3 }
 0x198   :  { %v1159_v16 = vadd.f32 %v1151_v5, %v1055_v57  ;;  %v1160_v9 = vsub.f32 %v1952_v13, %v1152_v1 }
 0x19a   :  { %v1167_v19 = vsub.f32 %v1955_v56, %v1159_v16  ;;  %1168 = vst [vmem:[#allocation4] sm:$0x3] %v1160_v9 }
 0x19c   :  { %1175 = vst [vmem:[#allocation4 + $0xe] sm:$0x3] %v1167_v19 }
 0x19d   :  { %1392 = shalt.err (!%p1389_p4)
}
 0x19e   :  { %s1393_s27 = scalar_lea.hbm %s1989_s2, 256 }
 0x19f   :  { %p1394_p5 = scmp.ne.s32.totalorder %s1989_s2, %s1393_s27  ;;  %p1397_p6 = scmp.lt.u32.totalorder %s1393_s27, %s1989_s2 }
 0x1a1   :  { %p1399_p7 = pnand %p1397_p6, %p1394_p5 }
 0x1a3   :  { %1402 = shalt.err (!%p1399_p7)
}
 0x1a4   :  { %s1408_s4 = smov 32   ;;  %s1409_s5 = smov 2  }
 0x1a5   :  { %1187 = dma.vmem_to_hbm [thread:$0]  %s1182_s23, 256, %s1989_s2, [#allocation5], %s1408_s4, %s1408_s4, %s1409_s5  }
 0x1a6   :  { %1403 = dma.done.wait [#allocation5], 256  }
 0x1a7   :  { %1404 = vsyncadd [#allocation5], 4294967040 }
 0x1a8   :  { %1191 = vsyncpa [#allocation5], 1 }

</bundles_post_ra>
